<compile_context>
chip_gen: v7x
topology: tpu7x:2x2x1
jax: 0.10.0
libtpu: 0.0.40
codegen_flags: <defaults>
</compile_context>

<pallas_src>
import functools
import math

import numpy as np
import jax
import jax.numpy as jnp
from jax.experimental import pallas as pl
from jax.experimental.pallas import tpu as pltpu

INV_LN2 = 1.0 / math.log(2.0)
INV_SQRT2 = 1.0 / math.sqrt(2.0)


def _sigmoid(x):
    # exact identity: sigmoid(x) = 0.5 * (tanh(x/2) + 1)  -> single EUP tanh, no divide
    return 0.5 * (jnp.tanh(0.5 * x) + 1.0)


def _erf(x):
    # Abramowitz & Stegun 7.1.26 polynomial (|abs err| < 1.5e-7); exact reciprocal
    # (review: approx recip could flip the sign of small CDF differences).
    a1, a2, a3, a4, a5 = (0.254829592, -0.284496736, 1.421413741,
                          -1.453152027, 1.061405429)
    p = 0.3275911
    s = jnp.where(x >= 0.0, 1.0, -1.0)
    ax = jnp.abs(x)
    t = 1.0 / (1.0 + p * ax)
    poly = ((((a5 * t + a4) * t + a3) * t + a2) * t + a1) * t
    return s * (1.0 - poly * jnp.exp(-ax * ax))


def _std_normal_cdf(x):
    return 0.5 * (1.0 + _erf(x * INV_SQRT2))


def _entropy_kernel(y_ref, ny_ref, nz_ref,
                    wenc_ref, benc_ref, wdec_ref, bdec_ref,
                    w0_ref, b0_ref, t0_ref,
                    w123_ref, b123_ref, t123_ref,
                    w4_ref, b4_ref,
                    y_tilde_ref, bits_y_ref, bits_z_ref,
                    *, num_scales, scale_min, scale_max,
                    likelihood_bound, chain_dtype):
    c, _ = y_ref.shape
    cz = nz_ref.shape[0]
    cdt = chain_dtype

    # ---- abs() pre-op of ScaleNoisyNormalEntropyModel ----
    y_abs = jnp.abs(y_ref[...])                                        # (C, T) f32

    # ---- synthetic hyper_encoder (1x1 conv) on the MXU ----
    z = jnp.dot(wenc_ref[...], y_abs,
                preferred_element_type=jnp.float32) + benc_ref[...]
    z_tilde = z + nz_ref[...]                                          # (Cz, T) f32

    # ---- deep-factorized hyperprior likelihood, batched over (lo, up) x channels ----
    # rows 0..Cz-1 = z_tilde - 0.5, rows Cz..2Cz-1 = z_tilde + 0.5 -> (2Cz, T)
    v = jnp.concatenate([z_tilde - 0.5, z_tilde + 0.5], axis=0).astype(cdt)

    # per-channel 1->3->3->3->3->1 chain as block-diagonal MXU matmuls (idle MXU),
    # only the GDN-style nonlinearity h + a*tanh(h) stays on the VPU/EUP (in cdt).
    h = jnp.dot(w0_ref[...], v, preferred_element_type=jnp.float32).astype(cdt)
    h = h + b0_ref[...]
    h = h + t0_ref[...] * jnp.tanh(h)
    for k in range(w123_ref.shape[0]):                                 # 3 middle layers
        h = jnp.dot(w123_ref[k], h, preferred_element_type=jnp.float32).astype(cdt)
        h = h + b123_ref[k]
        h = h + t123_ref[k] * jnp.tanh(h)
    logits = jnp.dot(w4_ref[...], h,
                     preferred_element_type=jnp.float32) + b4_ref[...]  # (2Cz, T) f32

    lo = logits[:cz]
    up = logits[cz:]
    sgn = jnp.where(lo + up > 0.0, -1.0, 1.0)        # numerically-stable sign trick
    sig = _sigmoid(jnp.concatenate([sgn, sgn], axis=0) * logits)        # f32
    pz = jnp.maximum(jnp.abs(sig[cz:] - sig[:cz]), likelihood_bound)
    bits_z = jnp.sum(-jnp.log(pz)) * INV_LN2                            # scalar (f32)
    bits_z_ref[...] = jnp.full(bits_z_ref.shape, bits_z, jnp.float32)

    # ---- synthetic hyper_decoder (1x1 conv) -> continuous scale indexes ----
    idx = jnp.dot(wdec_ref[...], z_tilde,
                  preferred_element_type=jnp.float32) + bdec_ref[...]
    idx = jnp.clip(idx, 0.0, float(num_scales - 1))   # identity_if_towards forward
    log_smin = math.log(scale_min)
    log_step = (math.log(scale_max) - log_smin) / (num_scales - 1)
    inv_scale = jnp.exp(-(log_smin + log_step * idx))                   # 1/scale, no divide

    # ---- indexed NoisyNormal prior on y (loc = 0, log-linear scale table) ----
    y_tilde = y_abs + ny_ref[...]
    values = jnp.abs(y_tilde)                          # loc == 0 -> symmetric trick
    arg = jnp.concatenate([(0.5 - values) * inv_scale,
                           (-0.5 - values) * inv_scale], axis=0)        # (2C, T)
    cdf = _std_normal_cdf(arg)                         # kept f32 (CDF-difference precision)
    py = jnp.maximum(jnp.abs(cdf[:c] - cdf[c:]), likelihood_bound)
    bits_y = jnp.sum(-jnp.log(py)) * INV_LN2
    bits_y_ref[...] = jnp.full(bits_y_ref.shape, bits_y, jnp.float32)

    y_tilde_ref[...] = y_tilde


def _pick_lane_tile(hw, cap, prefer_split):
    cap = min(cap, hw)
    if prefer_split and hw >= 256:
        cap = min(cap, hw // 2)            # >= 2 grid steps so both v7x TCs get work
    cap -= cap % 128
    cap = max(cap, 128)
    for cand in range(cap, 0, -128):
        if hw % cand == 0:
            return cand
    raise ValueError(f"H*W={hw} must be a multiple of 128")


def _default_chain_dtype():
    # bf16 transcendental chain only where the EUP/VPU have a bf16 datapath.
    try:
        kind = jax.devices()[0].device_kind.lower()
    except Exception:
        return jnp.float32
    for tag in ("cpu", "v2", "v3", "v4", "v5 lite", "v5lite", "v5e", "v5p"):
        if tag in kind:
            return jnp.float32
    return jnp.bfloat16


def _block_diag_dup(w_per_ch, dtype):
    # (Cz, fout, fin) per-channel weights -> (fout*2Cz, fin*2Cz) block-diagonal,
    # channels duplicated so one matrix serves both the (v-0.5) and (v+0.5) halves.
    w = np.asarray(w_per_ch, np.float32)
    cz, fout, fin = w.shape
    two = 2 * cz
    out = np.zeros((fout * two, fin * two), np.float32)
    for ci in range(two):
        ch = ci % cz
        rows = np.arange(fout) * two + ci
        cols = np.arange(fin) * two + ci
        out[np.ix_(rows, cols)] = w[ch]
    return jnp.asarray(out, dtype)


def _stack_dup(b_per_ch, dtype):
    # (Cz, fout, 1) -> (fout*2Cz, 1), same row ordering as _block_diag_dup.
    b = np.asarray(b_per_ch, np.float32)
    cz, fout = b.shape[0], b.shape[1]
    two = 2 * cz
    out = np.zeros((fout * two, 1), np.float32)
    for ci in range(two):
        out[np.arange(fout) * two + ci, 0] = b[ci % cz, :, 0]
    return jnp.asarray(out, dtype)


class ScaleNoisyNormalEntropyModelPallas:
    def __init__(self, num_y_channels, num_hyper_channels, key,
                 num_scales=64, scale_min=0.11, scale_max=256.0,
                 hyperprior_num_filters=(1, 3, 3, 3, 3, 1),
                 hyperprior_init_scale=10.0, likelihood_bound=1e-9,
                 max_lane_tile=4096, chain_dtype=None):
        self.cy = num_y_channels
        self.cz = num_hyper_channels
        self.num_scales = num_scales
        self.scale_min = scale_min
        self.scale_max = scale_max
        self.likelihood_bound = likelihood_bound
        # keeps the double-buffered working set well below the 32 MiB scoped-VMEM
        # default (v7x has only 64 MiB physical VMEM/TC); sweepable on v5e/v6e.
        self.max_lane_tile = max_lane_tile
        self.chain_dtype = chain_dtype if chain_dtype is not None else _default_chain_dtype()

        filters = tuple(hyperprior_num_filters)
        assert (len(filters) == 6 and filters[0] == 1 and filters[-1] == 1
                and len(set(filters[1:-1])) == 1), \
            "kernel packs a 1->f->f->f->f->1 factorized chain"

        ks = jax.random.split(key, 2 + len(filters) - 1)
        # synthetic hyper_encoder / hyper_decoder (1x1 conv stand-ins)
        self.w_enc = 0.2 * jax.random.normal(ks[0], (self.cz, self.cy), jnp.float32)
        self.b_enc = jnp.zeros((self.cz, 1), jnp.float32)
        self.w_dec = 0.2 * jax.random.normal(ks[1], (self.cy, self.cz), jnp.float32)
        self.b_dec = jnp.full((self.cy, 1), 20.0, jnp.float32)  # centers scale table

        # deep-factorized hyperprior parameters (deterministic TFC-style init)
        f_scale = hyperprior_init_scale ** (1.0 / (len(filters) - 1))
        H, B, A = [], [], []
        for k in range(len(filters) - 1):
            fin, fout = filters[k], filters[k + 1]
            init = math.log(math.expm1(1.0 / f_scale / fout))
            H.append(jnp.full((self.cz, fout, fin), init, jnp.float32))
            B.append(jax.random.uniform(ks[2 + k], (self.cz, fout, 1),
                                        jnp.float32, -0.5, 0.5))
            if k < len(filters) - 2:
                A.append(jnp.zeros((self.cz, fout, 1), jnp.float32))

        # ---- hoisted parameter transforms + block-diagonal MXU packing ----
        sp = [jax.nn.softplus(h_) for h_ in H]
        ta = [jnp.tanh(a_) for a_ in A]
        cdt = self.chain_dtype
        self.w0 = _block_diag_dup(sp[0], cdt)                       # (3*2Cz, 2Cz)
        self.b0 = _stack_dup(B[0], cdt)                             # (3*2Cz, 1)
        self.t0 = _stack_dup(ta[0], cdt)
        self.w123 = jnp.stack([_block_diag_dup(sp[k], cdt) for k in (1, 2, 3)])  # (3, R, R)
        self.b123 = jnp.stack([_stack_dup(B[k], cdt) for k in (1, 2, 3)])        # (3, R, 1)
        self.t123 = jnp.stack([_stack_dup(ta[k], cdt) for k in (1, 2, 3)])
        self.w4 = _block_diag_dup(sp[4], cdt)                       # (2Cz, 3*2Cz)
        self.b4 = _stack_dup(B[4], jnp.float32)                     # (2Cz, 1) f32 (logits stay f32)

    def __call__(self, x, noise_key):
        n, c, h, w = x.shape
        assert c == self.cy
        hw = h * w
        assert hw % 128 == 0, "H*W must be a multiple of 128"
        t_hw = _pick_lane_tile(hw, self.max_lane_tile, prefer_split=(n == 1))
        num_hw_tiles = hw // t_hw
        num_tiles_total = n * num_hw_tiles

        # free reshape: NCHW -> (N, C, H*W); no transpose passes over HBM.
        y3 = x.reshape(n, c, hw).astype(jnp.float32)
        # TODO(synk): uniform noise drawn with jax.random (same U(-0.5,0.5) distribution,
        # not bit-identical to the torch.rand stream of the reference).
        k1, k2 = jax.random.split(noise_key)
        ny = jax.random.uniform(k1, (n, c, hw), jnp.float32, -0.5, 0.5)
        nz = jax.random.uniform(k2, (n, self.cz, hw), jnp.float32, -0.5, 0.5)

        def tile_spec(rows):
            return pl.BlockSpec((None, rows, t_hw), lambda ni, ti: (ni, 0, ti))

        def full_spec(shape):
            nd = len(shape)
            return pl.BlockSpec(shape, lambda ni, ti, _nd=nd: (0,) * _nd)

        params = (self.w_enc, self.b_enc, self.w_dec, self.b_dec,
                  self.w0, self.b0, self.t0,
                  self.w123, self.b123, self.t123,
                  self.w4, self.b4)
        in_specs = ([tile_spec(c), tile_spec(c), tile_spec(self.cz)]
                    + [full_spec(p.shape) for p in params])

        # per-tile scalar bit partials -> tiny lane-dense (1, num_tiles*128) outputs
        bits_spec = pl.BlockSpec((1, 128),
                                 lambda ni, ti: (0, ni * num_hw_tiles + ti))
        out_shape = (jax.ShapeDtypeStruct((n, c, hw), jnp.float32),
                     jax.ShapeDtypeStruct((1, num_tiles_total * 128), jnp.float32),
                     jax.ShapeDtypeStruct((1, num_tiles_total * 128), jnp.float32))
        out_specs = (tile_spec(c), bits_spec, bits_spec)

        kern = functools.partial(_entropy_kernel,
                                 num_scales=self.num_scales,
                                 scale_min=self.scale_min,
                                 scale_max=self.scale_max,
                                 likelihood_bound=self.likelihood_bound,
                                 chain_dtype=self.chain_dtype)

        # advisory cost hint: kernel is transcendental-bound (EUP), not HBM-bound
        elems = n * hw
        r = self.w0.shape[0]          # 3*2Cz
        two = self.w4.shape[0]        # 2Cz
        cost = pl.CostEstimate(
            flops=int(2 * elems * (r * two + 3 * r * r + two * r
                                   + 2 * self.cz * self.cy)),
            transcendentals=int(elems * (4 * r + two + 2 * c + c + self.cz + c)),
            bytes_accessed=int(4 * elems * (3 * c + self.cz)))

        y_tilde3, bits_y_p, bits_z_p = pl.pallas_call(
            kern,
            grid=(n, num_hw_tiles),
            in_specs=in_specs,
            out_specs=out_specs,
            out_shape=out_shape,
            compiler_params=pltpu.CompilerParams(
                dimension_semantics=("parallel", "parallel")),
            cost_estimate=cost,
        )(y3, ny, nz, *params)

        y_tilde = y_tilde3.reshape(n, c, h, w)
        loss_dict = {
            "bits_loss": jnp.sum(bits_y_p.reshape(num_tiles_total, 128)[:, 0]),
            "hyper_bits_loss": jnp.sum(bits_z_p.reshape(num_tiles_total, 128)[:, 0]),
        }
        return y_tilde, loss_dict


if __name__ == "__main__":
    key = jax.random.PRNGKey(0)
    kx, kp, kn = jax.random.split(key, 3)

    N, C, H, W = 2, 4, 16, 16
    x = jax.random.normal(kx, (N, C, H, W), jnp.float32)

    model = ScaleNoisyNormalEntropyModelPallas(num_y_channels=C,
                                               num_hyper_channels=4,
                                               key=kp)
    y_tilde, loss_dict = model(x, noise_key=kn)
    jax.block_until_ready((y_tilde, loss_dict))

    assert y_tilde.shape == x.shape
    assert bool(jnp.isfinite(loss_dict["bits_loss"]))
    assert bool(jnp.isfinite(loss_dict["hyper_bits_loss"]))
    print("KERNEL_OK")
</pallas_src>

<mosaic_0001>
module attributes {stable_mosaic.version = 11 : i64} {
  func.func @_entropy_kernel(%arg0: i32, %arg1: i32, %arg2: memref<1x4x256xf32, #tpu.memory_space<vmem>>, %arg3: memref<1x4x256xf32, #tpu.memory_space<vmem>>, %arg4: memref<1x4x256xf32, #tpu.memory_space<vmem>>, %arg5: memref<4x4xf32, #tpu.memory_space<vmem>>, %arg6: memref<4x1xf32, #tpu.memory_space<vmem>>, %arg7: memref<4x4xf32, #tpu.memory_space<vmem>>, %arg8: memref<4x1xf32, #tpu.memory_space<vmem>>, %arg9: memref<24x8xf32, #tpu.memory_space<vmem>>, %arg10: memref<24x1xf32, #tpu.memory_space<vmem>>, %arg11: memref<24x1xf32, #tpu.memory_space<vmem>>, %arg12: memref<3x24x24xf32, #tpu.memory_space<vmem>>, %arg13: memref<3x24x1xf32, #tpu.memory_space<vmem>>, %arg14: memref<3x24x1xf32, #tpu.memory_space<vmem>>, %arg15: memref<8x24xf32, #tpu.memory_space<vmem>>, %arg16: memref<8x1xf32, #tpu.memory_space<vmem>>, %arg17: memref<1x4x256xf32, #tpu.memory_space<vmem>>, %arg18: memref<1x128xf32, #tpu.memory_space<vmem>>, %arg19: memref<1x128xf32, #tpu.memory_space<vmem>>) attributes {dimension_semantics = [#tpu.dimension_semantics<parallel>, #tpu.dimension_semantics<parallel>], iteration_bounds = array<i64: 2, 1>, scalar_prefetch = 0 : i64, scratch_operands = 0 : i64, tpu.core_type = #tpu.core_type<tc>, window_params = [{transform_indices = @transform_0, window_bounds = array<i64: 1, 4, 256>}, {transform_indices = @transform_1, window_bounds = array<i64: 1, 4, 256>}, {transform_indices = @transform_2, window_bounds = array<i64: 1, 4, 256>}, {pipeline_mode = #tpu.pipeline_mode<synchronous>, transform_indices = @transform_3, window_bounds = array<i64: 4, 4>}, {pipeline_mode = #tpu.pipeline_mode<synchronous>, transform_indices = @transform_4, window_bounds = array<i64: 4, 1>}, {pipeline_mode = #tpu.pipeline_mode<synchronous>, transform_indices = @transform_5, window_bounds = array<i64: 4, 4>}, {pipeline_mode = #tpu.pipeline_mode<synchronous>, transform_indices = @transform_6, window_bounds = array<i64: 4, 1>}, {pipeline_mode = #tpu.pipeline_mode<synchronous>, transform_indices = @transform_7, window_bounds = array<i64: 24, 8>}, {pipeline_mode = #tpu.pipeline_mode<synchronous>, transform_indices = @transform_8, window_bounds = array<i64: 24, 1>}, {pipeline_mode = #tpu.pipeline_mode<synchronous>, transform_indices = @transform_9, window_bounds = array<i64: 24, 1>}, {pipeline_mode = #tpu.pipeline_mode<synchronous>, transform_indices = @transform_10, window_bounds = array<i64: 3, 24, 24>}, {pipeline_mode = #tpu.pipeline_mode<synchronous>, transform_indices = @transform_11, window_bounds = array<i64: 3, 24, 1>}, {pipeline_mode = #tpu.pipeline_mode<synchronous>, transform_indices = @transform_12, window_bounds = array<i64: 3, 24, 1>}, {pipeline_mode = #tpu.pipeline_mode<synchronous>, transform_indices = @transform_13, window_bounds = array<i64: 8, 24>}, {pipeline_mode = #tpu.pipeline_mode<synchronous>, transform_indices = @transform_14, window_bounds = array<i64: 8, 1>}, {transform_indices = @transform_15, window_bounds = array<i64: 1, 4, 256>}, {transform_indices = @transform_16, window_bounds = array<i64: 1, 128>}, {transform_indices = @transform_17, window_bounds = array<i64: 1, 128>}]} {
    %c0 = arith.constant 0 : index
    %c0_0 = arith.constant 0 : index
    %c0_1 = arith.constant 0 : index
    %0 = vector.load %arg2[%c0, %c0_0, %c0_1] : memref<1x4x256xf32, #tpu.memory_space<vmem>>, vector<1x4x256xf32>
    %1 = vector.shape_cast %0 : vector<1x4x256xf32> to vector<4x256xf32>
    %2 = math.absf %1 : vector<4x256xf32>
    %c0_2 = arith.constant 0 : index
    %c0_3 = arith.constant 0 : index
    %3 = vector.load %arg5[%c0_2, %c0_3] : memref<4x4xf32, #tpu.memory_space<vmem>>, vector<4x4xf32>
    %cst = arith.constant dense<0.000000e+00> : vector<4x256xf32>
    %4 = tpu.matmul %3, %2, %cst {dimension_numbers = #tpu.dot_dimension_numbers<[1], [0], [0], [1], [0, 0, 1, 1], [], []>} : vector<4x4xf32>, vector<4x256xf32>, vector<4x256xf32> -> vector<4x256xf32>
    %c0_4 = arith.constant 0 : index
    %c0_5 = arith.constant 0 : index
    %5 = vector.load %arg6[%c0_4, %c0_5] : memref<4x1xf32, #tpu.memory_space<vmem>>, vector<4x1xf32>
    %6 = vector.broadcast %5 : vector<4x1xf32> to vector<4x256xf32>
    %7 = arith.addf %4, %6 : vector<4x256xf32>
    %c0_6 = arith.constant 0 : index
    %c0_7 = arith.constant 0 : index
    %c0_8 = arith.constant 0 : index
    %8 = vector.load %arg4[%c0_6, %c0_7, %c0_8] : memref<1x4x256xf32, #tpu.memory_space<vmem>>, vector<1x4x256xf32>
    %9 = vector.shape_cast %8 : vector<1x4x256xf32> to vector<4x256xf32>
    %10 = arith.addf %7, %9 : vector<4x256xf32>
    %cst_9 = arith.constant 5.000000e-01 : f32
    %11 = vector.broadcast %cst_9 : f32 to vector<4x256xf32>
    %12 = arith.subf %10, %11 : vector<4x256xf32>
    %cst_10 = arith.constant 5.000000e-01 : f32
    %13 = vector.broadcast %cst_10 : f32 to vector<4x256xf32>
    %14 = arith.addf %10, %13 : vector<4x256xf32>
    %15 = tpu.concatenate %12, %14 in 0 : vector<4x256xf32>, vector<4x256xf32> -> vector<8x256xf32>
    %c0_11 = arith.constant 0 : index
    %c0_12 = arith.constant 0 : index
    %16 = vector.load %arg9[%c0_11, %c0_12] : memref<24x8xf32, #tpu.memory_space<vmem>>, vector<24x8xf32>
    %cst_13 = arith.constant dense<0.000000e+00> : vector<24x256xf32>
    %17 = tpu.matmul %16, %15, %cst_13 {dimension_numbers = #tpu.dot_dimension_numbers<[1], [0], [0], [1], [0, 0, 1, 1], [], []>} : vector<24x8xf32>, vector<8x256xf32>, vector<24x256xf32> -> vector<24x256xf32>
    %c0_14 = arith.constant 0 : index
    %c0_15 = arith.constant 0 : index
    %18 = vector.load %arg10[%c0_14, %c0_15] : memref<24x1xf32, #tpu.memory_space<vmem>>, vector<24x1xf32>
    %19 = vector.broadcast %18 : vector<24x1xf32> to vector<24x256xf32>
    %20 = arith.addf %17, %19 : vector<24x256xf32>
    %c0_16 = arith.constant 0 : index
    %c0_17 = arith.constant 0 : index
    %21 = vector.load %arg11[%c0_16, %c0_17] : memref<24x1xf32, #tpu.memory_space<vmem>>, vector<24x1xf32>
    %22 = math.tanh %20 : vector<24x256xf32>
    %23 = vector.broadcast %21 : vector<24x1xf32> to vector<24x256xf32>
    %24 = arith.mulf %23, %22 : vector<24x256xf32>
    %25 = arith.addf %20, %24 : vector<24x256xf32>
    %c0_18 = arith.constant 0 : index
    %c0_19 = arith.constant 0 : index
    %c0_20 = arith.constant 0 : index
    %26 = vector.load %arg12[%c0_18, %c0_19, %c0_20] : memref<3x24x24xf32, #tpu.memory_space<vmem>>, vector<1x24x24xf32>
    %27 = vector.shape_cast %26 : vector<1x24x24xf32> to vector<24x24xf32>
    %cst_21 = arith.constant dense<0.000000e+00> : vector<24x256xf32>
    %28 = tpu.matmul %27, %25, %cst_21 {dimension_numbers = #tpu.dot_dimension_numbers<[1], [0], [0], [1], [0, 0, 1, 1], [], []>} : vector<24x24xf32>, vector<24x256xf32>, vector<24x256xf32> -> vector<24x256xf32>
    %c0_22 = arith.constant 0 : index
    %c0_23 = arith.constant 0 : index
    %c0_24 = arith.constant 0 : index
    %29 = vector.load %arg13[%c0_22, %c0_23, %c0_24] : memref<3x24x1xf32, #tpu.memory_space<vmem>>, vector<1x24x1xf32>
    %30 = vector.shape_cast %29 : vector<1x24x1xf32> to vector<24x1xf32>
    %31 = vector.broadcast %30 : vector<24x1xf32> to vector<24x256xf32>
    %32 = arith.addf %28, %31 : vector<24x256xf32>
    %c0_25 = arith.constant 0 : index
    %c0_26 = arith.constant 0 : index
    %c0_27 = arith.constant 0 : index
    %33 = vector.load %arg14[%c0_25, %c0_26, %c0_27] : memref<3x24x1xf32, #tpu.memory_space<vmem>>, vector<1x24x1xf32>
    %34 = vector.shape_cast %33 : vector<1x24x1xf32> to vector<24x1xf32>
    %35 = math.tanh %32 : vector<24x256xf32>
    %36 = vector.broadcast %34 : vector<24x1xf32> to vector<24x256xf32>
    %37 = arith.mulf %36, %35 : vector<24x256xf32>
    %38 = arith.addf %32, %37 : vector<24x256xf32>
    %c1 = arith.constant 1 : index
    %c0_28 = arith.constant 0 : index
    %c0_29 = arith.constant 0 : index
    %39 = vector.load %arg12[%c1, %c0_28, %c0_29] : memref<3x24x24xf32, #tpu.memory_space<vmem>>, vector<1x24x24xf32>
    %40 = vector.shape_cast %39 : vector<1x24x24xf32> to vector<24x24xf32>
    %cst_30 = arith.constant dense<0.000000e+00> : vector<24x256xf32>
    %41 = tpu.matmul %40, %38, %cst_30 {dimension_numbers = #tpu.dot_dimension_numbers<[1], [0], [0], [1], [0, 0, 1, 1], [], []>} : vector<24x24xf32>, vector<24x256xf32>, vector<24x256xf32> -> vector<24x256xf32>
    %c1_31 = arith.constant 1 : index
    %c0_32 = arith.constant 0 : index
    %c0_33 = arith.constant 0 : index
    %42 = vector.load %arg13[%c1_31, %c0_32, %c0_33] : memref<3x24x1xf32, #tpu.memory_space<vmem>>, vector<1x24x1xf32>
    %43 = vector.shape_cast %42 : vector<1x24x1xf32> to vector<24x1xf32>
    %44 = vector.broadcast %43 : vector<24x1xf32> to vector<24x256xf32>
    %45 = arith.addf %41, %44 : vector<24x256xf32>
    %c1_34 = arith.constant 1 : index
    %c0_35 = arith.constant 0 : index
    %c0_36 = arith.constant 0 : index
    %46 = vector.load %arg14[%c1_34, %c0_35, %c0_36] : memref<3x24x1xf32, #tpu.memory_space<vmem>>, vector<1x24x1xf32>
    %47 = vector.shape_cast %46 : vector<1x24x1xf32> to vector<24x1xf32>
    %48 = math.tanh %45 : vector<24x256xf32>
    %49 = vector.broadcast %47 : vector<24x1xf32> to vector<24x256xf32>
    %50 = arith.mulf %49, %48 : vector<24x256xf32>
    %51 = arith.addf %45, %50 : vector<24x256xf32>
    %c2 = arith.constant 2 : index
    %c0_37 = arith.constant 0 : index
    %c0_38 = arith.constant 0 : index
    %52 = vector.load %arg12[%c2, %c0_37, %c0_38] : memref<3x24x24xf32, #tpu.memory_space<vmem>>, vector<1x24x24xf32>
    %53 = vector.shape_cast %52 : vector<1x24x24xf32> to vector<24x24xf32>
    %cst_39 = arith.constant dense<0.000000e+00> : vector<24x256xf32>
    %54 = tpu.matmul %53, %51, %cst_39 {dimension_numbers = #tpu.dot_dimension_numbers<[1], [0], [0], [1], [0, 0, 1, 1], [], []>} : vector<24x24xf32>, vector<24x256xf32>, vector<24x256xf32> -> vector<24x256xf32>
    %c2_40 = arith.constant 2 : index
    %c0_41 = arith.constant 0 : index
    %c0_42 = arith.constant 0 : index
    %55 = vector.load %arg13[%c2_40, %c0_41, %c0_42] : memref<3x24x1xf32, #tpu.memory_space<vmem>>, vector<1x24x1xf32>
    %56 = vector.shape_cast %55 : vector<1x24x1xf32> to vector<24x1xf32>
    %57 = vector.broadcast %56 : vector<24x1xf32> to vector<24x256xf32>
    %58 = arith.addf %54, %57 : vector<24x256xf32>
    %c2_43 = arith.constant 2 : index
    %c0_44 = arith.constant 0 : index
    %c0_45 = arith.constant 0 : index
    %59 = vector.load %arg14[%c2_43, %c0_44, %c0_45] : memref<3x24x1xf32, #tpu.memory_space<vmem>>, vector<1x24x1xf32>
    %60 = vector.shape_cast %59 : vector<1x24x1xf32> to vector<24x1xf32>
    %61 = math.tanh %58 : vector<24x256xf32>
    %62 = vector.broadcast %60 : vector<24x1xf32> to vector<24x256xf32>
    %63 = arith.mulf %62, %61 : vector<24x256xf32>
    %64 = arith.addf %58, %63 : vector<24x256xf32>
    %c0_46 = arith.constant 0 : index
    %c0_47 = arith.constant 0 : index
    %65 = vector.load %arg15[%c0_46, %c0_47] : memref<8x24xf32, #tpu.memory_space<vmem>>, vector<8x24xf32>
    %cst_48 = arith.constant dense<0.000000e+00> : vector<8x256xf32>
    %66 = tpu.matmul %65, %64, %cst_48 {dimension_numbers = #tpu.dot_dimension_numbers<[1], [0], [0], [1], [0, 0, 1, 1], [], []>} : vector<8x24xf32>, vector<24x256xf32>, vector<8x256xf32> -> vector<8x256xf32>
    %c0_49 = arith.constant 0 : index
    %c0_50 = arith.constant 0 : index
    %67 = vector.load %arg16[%c0_49, %c0_50] : memref<8x1xf32, #tpu.memory_space<vmem>>, vector<8x1xf32>
    %68 = vector.broadcast %67 : vector<8x1xf32> to vector<8x256xf32>
    %69 = arith.addf %66, %68 : vector<8x256xf32>
    %70 = vector.extract_strided_slice %69 {offsets = [0, 0], sizes = [4, 256], strides = [1, 1]} : vector<8x256xf32> to vector<4x256xf32>
    %71 = vector.extract_strided_slice %69 {offsets = [4, 0], sizes = [4, 256], strides = [1, 1]} : vector<8x256xf32> to vector<4x256xf32>
    %72 = arith.addf %70, %71 : vector<4x256xf32>
    %cst_51 = arith.constant 0.000000e+00 : f32
    %73 = vector.broadcast %cst_51 : f32 to vector<4x256xf32>
    %74 = arith.cmpf ogt, %72, %73 : vector<4x256xf32>
    %cst_52 = arith.constant -1.000000e+00 : f32
    %cst_53 = arith.constant 1.000000e+00 : f32
    %75 = vector.broadcast %cst_52 : f32 to vector<4x256xf32>
    %76 = vector.broadcast %cst_53 : f32 to vector<4x256xf32>
    %77 = arith.select %74, %75, %76 : vector<4x256xi1>, vector<4x256xf32>
    %78 = tpu.concatenate %77, %77 in 0 : vector<4x256xf32>, vector<4x256xf32> -> vector<8x256xf32>
    %79 = arith.mulf %78, %69 : vector<8x256xf32>
    %cst_54 = arith.constant 5.000000e-01 : f32
    %80 = vector.broadcast %cst_54 : f32 to vector<8x256xf32>
    %81 = arith.mulf %80, %79 : vector<8x256xf32>
    %82 = math.tanh %81 : vector<8x256xf32>
    %cst_55 = arith.constant 1.000000e+00 : f32
    %83 = vector.broadcast %cst_55 : f32 to vector<8x256xf32>
    %84 = arith.addf %82, %83 : vector<8x256xf32>
    %cst_56 = arith.constant 5.000000e-01 : f32
    %85 = vector.broadcast %cst_56 : f32 to vector<8x256xf32>
    %86 = arith.mulf %85, %84 : vector<8x256xf32>
    %87 = vector.extract_strided_slice %86 {offsets = [4, 0], sizes = [4, 256], strides = [1, 1]} : vector<8x256xf32> to vector<4x256xf32>
    %88 = vector.extract_strided_slice %86 {offsets = [0, 0], sizes = [4, 256], strides = [1, 1]} : vector<8x256xf32> to vector<4x256xf32>
    %89 = arith.subf %87, %88 : vector<4x256xf32>
    %90 = math.absf %89 : vector<4x256xf32>
    %cst_57 = arith.constant 9.99999971E-10 : f32
    %91 = vector.broadcast %cst_57 : f32 to vector<4x256xf32>
    %92 = arith.maximumf %90, %91 : vector<4x256xf32>
    %93 = math.log %92 : vector<4x256xf32>
    %cst_58 = arith.constant 0.000000e+00 : f32
    %94 = vector.broadcast %cst_58 : f32 to vector<4x256xf32>
    %95 = arith.subf %94, %93 : vector<4x256xf32>
    %96 = vector.shape_cast %95 : vector<4x256xf32> to vector<1x4x256xf32>
    %cst_59 = arith.constant dense<0.000000e+00> : vector<1xf32>
    %97 = vector.multi_reduction <add>, %96, %cst_59 [1, 2] : vector<1x4x256xf32> to vector<1xf32>
    %98 = vector.shape_cast %97 : vector<1xf32> to vector<1x1x1xf32>
    %99 = vector.extract %98[0, 0, 0] : f32 from vector<1x1x1xf32>
    %cst_60 = arith.constant 1.44269502 : f32
    %100 = arith.mulf %99, %cst_60 : f32
    %101 = vector.broadcast %100 : f32 to vector<1x128xf32>
    %c0_61 = arith.constant 0 : index
    %c0_62 = arith.constant 0 : index
    %102 = vector.load %arg19[%c0_61, %c0_62] : memref<1x128xf32, #tpu.memory_space<vmem>>, vector<1x128xf32>
    tpu.vector_store %arg19[%c0_61, %c0_62], %101 {strides = array<i32>} : memref<1x128xf32, #tpu.memory_space<vmem>>, vector<1x128xf32>,
    %c0_63 = arith.constant 0 : index
    %c0_64 = arith.constant 0 : index
    %103 = vector.load %arg7[%c0_63, %c0_64] : memref<4x4xf32, #tpu.memory_space<vmem>>, vector<4x4xf32>
    %cst_65 = arith.constant dense<0.000000e+00> : vector<4x256xf32>
    %104 = tpu.matmul %103, %10, %cst_65 {dimension_numbers = #tpu.dot_dimension_numbers<[1], [0], [0], [1], [0, 0, 1, 1], [], []>} : vector<4x4xf32>, vector<4x256xf32>, vector<4x256xf32> -> vector<4x256xf32>
    %c0_66 = arith.constant 0 : index
    %c0_67 = arith.constant 0 : index
    %105 = vector.load %arg8[%c0_66, %c0_67] : memref<4x1xf32, #tpu.memory_space<vmem>>, vector<4x1xf32>
    %106 = vector.broadcast %105 : vector<4x1xf32> to vector<4x256xf32>
    %107 = arith.addf %104, %106 : vector<4x256xf32>
    %cst_68 = arith.constant 0.000000e+00 : f32
    %cst_69 = arith.constant 6.300000e+01 : f32
    %108 = vector.broadcast %cst_68 : f32 to vector<4x256xf32>
    %109 = arith.maximumf %108, %107 : vector<4x256xf32>
    %110 = vector.broadcast %cst_69 : f32 to vector<4x256xf32>
    %111 = arith.minimumf %110, %109 : vector<4x256xf32>
    %cst_70 = arith.constant 0.123054802 : f32
    %112 = vector.broadcast %cst_70 : f32 to vector<4x256xf32>
    %113 = arith.mulf %112, %111 : vector<4x256xf32>
    %cst_71 = arith.constant -2.20727491 : f32
    %114 = vector.broadcast %cst_71 : f32 to vector<4x256xf32>
    %115 = arith.addf %114, %113 : vector<4x256xf32>
    %cst_72 = arith.constant 0.000000e+00 : f32
    %116 = vector.broadcast %cst_72 : f32 to vector<4x256xf32>
    %117 = arith.subf %116, %115 : vector<4x256xf32>
    %118 = math.exp %117 : vector<4x256xf32>
    %c0_73 = arith.constant 0 : index
    %c0_74 = arith.constant 0 : index
    %c0_75 = arith.constant 0 : index
    %119 = vector.load %arg3[%c0_73, %c0_74, %c0_75] : memref<1x4x256xf32, #tpu.memory_space<vmem>>, vector<1x4x256xf32>
    %120 = vector.shape_cast %119 : vector<1x4x256xf32> to vector<4x256xf32>
    %121 = arith.addf %2, %120 : vector<4x256xf32>
    %122 = math.absf %121 : vector<4x256xf32>
    %cst_76 = arith.constant 5.000000e-01 : f32
    %123 = vector.broadcast %cst_76 : f32 to vector<4x256xf32>
    %124 = arith.subf %123, %122 : vector<4x256xf32>
    %125 = arith.mulf %124, %118 : vector<4x256xf32>
    %cst_77 = arith.constant -5.000000e-01 : f32
    %126 = vector.broadcast %cst_77 : f32 to vector<4x256xf32>
    %127 = arith.subf %126, %122 : vector<4x256xf32>
    %128 = arith.mulf %127, %118 : vector<4x256xf32>
    %129 = tpu.concatenate %125, %128 in 0 : vector<4x256xf32>, vector<4x256xf32> -> vector<8x256xf32>
    %cst_78 = arith.constant 0.707106769 : f32
    %130 = vector.broadcast %cst_78 : f32 to vector<8x256xf32>
    %131 = arith.mulf %129, %130 : vector<8x256xf32>
    %cst_79 = arith.constant 0.000000e+00 : f32
    %132 = vector.broadcast %cst_79 : f32 to vector<8x256xf32>
    %133 = arith.cmpf oge, %131, %132 : vector<8x256xf32>
    %cst_80 = arith.constant 1.000000e+00 : f32
    %cst_81 = arith.constant -1.000000e+00 : f32
    %134 = vector.broadcast %cst_80 : f32 to vector<8x256xf32>
    %135 = vector.broadcast %cst_81 : f32 to vector<8x256xf32>
    %136 = arith.select %133, %134, %135 : vector<8x256xi1>, vector<8x256xf32>
    %137 = math.absf %131 : vector<8x256xf32>
    %cst_82 = arith.constant 0.327591091 : f32
    %138 = vector.broadcast %cst_82 : f32 to vector<8x256xf32>
    %139 = arith.mulf %138, %137 : vector<8x256xf32>
    %cst_83 = arith.constant 1.000000e+00 : f32
    %140 = vector.broadcast %cst_83 : f32 to vector<8x256xf32>
    %141 = arith.addf %140, %139 : vector<8x256xf32>
    %cst_84 = arith.constant 1.000000e+00 : f32
    %142 = vector.broadcast %cst_84 : f32 to vector<8x256xf32>
    %143 = arith.divf %142, %141 : vector<8x256xf32>
    %cst_85 = arith.constant 1.06140542 : f32
    %144 = vector.broadcast %cst_85 : f32 to vector<8x256xf32>
    %145 = arith.mulf %144, %143 : vector<8x256xf32>
    %cst_86 = arith.constant -1.45315206 : f32
    %146 = vector.broadcast %cst_86 : f32 to vector<8x256xf32>
    %147 = arith.addf %145, %146 : vector<8x256xf32>
    %148 = arith.mulf %147, %143 : vector<8x256xf32>
    %cst_87 = arith.constant 1.42141378 : f32
    %149 = vector.broadcast %cst_87 : f32 to vector<8x256xf32>
    %150 = arith.addf %148, %149 : vector<8x256xf32>
    %151 = arith.mulf %150, %143 : vector<8x256xf32>
    %cst_88 = arith.constant -0.284496725 : f32
    %152 = vector.broadcast %cst_88 : f32 to vector<8x256xf32>
    %153 = arith.addf %151, %152 : vector<8x256xf32>
    %154 = arith.mulf %153, %143 : vector<8x256xf32>
    %cst_89 = arith.constant 0.254829586 : f32
    %155 = vector.broadcast %cst_89 : f32 to vector<8x256xf32>
    %156 = arith.addf %154, %155 : vector<8x256xf32>
    %157 = arith.mulf %156, %143 : vector<8x256xf32>
    %cst_90 = arith.constant 0.000000e+00 : f32
    %158 = vector.broadcast %cst_90 : f32 to vector<8x256xf32>
    %159 = arith.subf %158, %137 : vector<8x256xf32>
    %160 = arith.mulf %159, %137 : vector<8x256xf32>
    %161 = math.exp %160 : vector<8x256xf32>
    %162 = arith.mulf %157, %161 : vector<8x256xf32>
    %cst_91 = arith.constant 1.000000e+00 : f32
    %163 = vector.broadcast %cst_91 : f32 to vector<8x256xf32>
    %164 = arith.subf %163, %162 : vector<8x256xf32>
    %165 = arith.mulf %136, %164 : vector<8x256xf32>
    %cst_92 = arith.constant 1.000000e+00 : f32
    %166 = vector.broadcast %cst_92 : f32 to vector<8x256xf32>
    %167 = arith.addf %166, %165 : vector<8x256xf32>
    %cst_93 = arith.constant 5.000000e-01 : f32
    %168 = vector.broadcast %cst_93 : f32 to vector<8x256xf32>
    %169 = arith.mulf %168, %167 : vector<8x256xf32>
    %170 = vector.extract_strided_slice %169 {offsets = [0, 0], sizes = [4, 256], strides = [1, 1]} : vector<8x256xf32> to vector<4x256xf32>
    %171 = vector.extract_strided_slice %169 {offsets = [4, 0], sizes = [4, 256], strides = [1, 1]} : vector<8x256xf32> to vector<4x256xf32>
    %172 = arith.subf %170, %171 : vector<4x256xf32>
    %173 = math.absf %172 : vector<4x256xf32>
    %cst_94 = arith.constant 9.99999971E-10 : f32
    %174 = vector.broadcast %cst_94 : f32 to vector<4x256xf32>
    %175 = arith.maximumf %173, %174 : vector<4x256xf32>
    %176 = math.log %175 : vector<4x256xf32>
    %cst_95 = arith.constant 0.000000e+00 : f32
    %177 = vector.broadcast %cst_95 : f32 to vector<4x256xf32>
    %178 = arith.subf %177, %176 : vector<4x256xf32>
    %179 = vector.shape_cast %178 : vector<4x256xf32> to vector<1x4x256xf32>
    %cst_96 = arith.constant dense<0.000000e+00> : vector<1xf32>
    %180 = vector.multi_reduction <add>, %179, %cst_96 [1, 2] : vector<1x4x256xf32> to vector<1xf32>
    %181 = vector.shape_cast %180 : vector<1xf32> to vector<1x1x1xf32>
    %182 = vector.extract %181[0, 0, 0] : f32 from vector<1x1x1xf32>
    %cst_97 = arith.constant 1.44269502 : f32
    %183 = arith.mulf %182, %cst_97 : f32
    %184 = vector.broadcast %183 : f32 to vector<1x128xf32>
    %c0_98 = arith.constant 0 : index
    %c0_99 = arith.constant 0 : index
    %185 = vector.load %arg18[%c0_98, %c0_99] : memref<1x128xf32, #tpu.memory_space<vmem>>, vector<1x128xf32>
    tpu.vector_store %arg18[%c0_98, %c0_99], %184 {strides = array<i32>} : memref<1x128xf32, #tpu.memory_space<vmem>>, vector<1x128xf32>,
    %c0_100 = arith.constant 0 : index
    %c0_101 = arith.constant 0 : index
    %c0_102 = arith.constant 0 : index
    %186 = vector.load %arg17[%c0_100, %c0_101, %c0_102] : memref<1x4x256xf32, #tpu.memory_space<vmem>>, vector<1x4x256xf32>
    %187 = vector.shape_cast %186 : vector<1x4x256xf32> to vector<4x256xf32>
    %188 = vector.shape_cast %121 : vector<4x256xf32> to vector<1x4x256xf32>
    tpu.vector_store %arg17[%c0_100, %c0_101, %c0_102], %188 {strides = array<i32>} : memref<1x4x256xf32, #tpu.memory_space<vmem>>, vector<1x4x256xf32>,
    return
  }
  func.func @transform_0(%arg0: i32, %arg1: i32) -> (i32, i32, i32) {
    %c0_i32 = arith.constant 0 : i32
    %c0_i32_0 = arith.constant 0 : i32
    return %arg0, %c0_i32, %arg1 : i32, i32, i32
  }
  func.func @transform_1(%arg0: i32, %arg1: i32) -> (i32, i32, i32) {
    %c0_i32 = arith.constant 0 : i32
    %c0_i32_0 = arith.constant 0 : i32
    return %arg0, %c0_i32, %arg1 : i32, i32, i32
  }
  func.func @transform_2(%arg0: i32, %arg1: i32) -> (i32, i32, i32) {
    %c0_i32 = arith.constant 0 : i32
    %c0_i32_0 = arith.constant 0 : i32
    return %arg0, %c0_i32, %arg1 : i32, i32, i32
  }
  func.func @transform_3(%arg0: i32, %arg1: i32) -> (i32, i32) {
    %c0_i32 = arith.constant 0 : i32
    %c0_i32_0 = arith.constant 0 : i32
    %c0_i32_1 = arith.constant 0 : i32
    return %c0_i32, %c0_i32_0 : i32, i32
  }
  func.func @transform_4(%arg0: i32, %arg1: i32) -> (i32, i32) {
    %c0_i32 = arith.constant 0 : i32
    %c0_i32_0 = arith.constant 0 : i32
    %c0_i32_1 = arith.constant 0 : i32
    return %c0_i32, %c0_i32_0 : i32, i32
  }
  func.func @transform_5(%arg0: i32, %arg1: i32) -> (i32, i32) {
    %c0_i32 = arith.constant 0 : i32
    %c0_i32_0 = arith.constant 0 : i32
    %c0_i32_1 = arith.constant 0 : i32
    return %c0_i32, %c0_i32_0 : i32, i32
  }
  func.func @transform_6(%arg0: i32, %arg1: i32) -> (i32, i32) {
    %c0_i32 = arith.constant 0 : i32
    %c0_i32_0 = arith.constant 0 : i32
    %c0_i32_1 = arith.constant 0 : i32
    return %c0_i32, %c0_i32_0 : i32, i32
  }
  func.func @transform_7(%arg0: i32, %arg1: i32) -> (i32, i32) {
    %c0_i32 = arith.constant 0 : i32
    %c0_i32_0 = arith.constant 0 : i32
    %c0_i32_1 = arith.constant 0 : i32
    return %c0_i32, %c0_i32_0 : i32, i32
  }
  func.func @transform_8(%arg0: i32, %arg1: i32) -> (i32, i32) {
    %c0_i32 = arith.constant 0 : i32
    %c0_i32_0 = arith.constant 0 : i32
    %c0_i32_1 = arith.constant 0 : i32
    return %c0_i32, %c0_i32_0 : i32, i32
  }
  func.func @transform_9(%arg0: i32, %arg1: i32) -> (i32, i32) {
    %c0_i32 = arith.constant 0 : i32
    %c0_i32_0 = arith.constant 0 : i32
    %c0_i32_1 = arith.constant 0 : i32
    return %c0_i32, %c0_i32_0 : i32, i32
  }
  func.func @transform_10(%arg0: i32, %arg1: i32) -> (i32, i32, i32) {
    %c0_i32 = arith.constant 0 : i32
    %c0_i32_0 = arith.constant 0 : i32
    %c0_i32_1 = arith.constant 0 : i32
    %c0_i32_2 = arith.constant 0 : i32
    return %c0_i32, %c0_i32_0, %c0_i32_1 : i32, i32, i32
  }
  func.func @transform_11(%arg0: i32, %arg1: i32) -> (i32, i32, i32) {
    %c0_i32 = arith.constant 0 : i32
    %c0_i32_0 = arith.constant 0 : i32
    %c0_i32_1 = arith.constant 0 : i32
    %c0_i32_2 = arith.constant 0 : i32
    return %c0_i32, %c0_i32_0, %c0_i32_1 : i32, i32, i32
  }
  func.func @transform_12(%arg0: i32, %arg1: i32) -> (i32, i32, i32) {
    %c0_i32 = arith.constant 0 : i32
    %c0_i32_0 = arith.constant 0 : i32
    %c0_i32_1 = arith.constant 0 : i32
    %c0_i32_2 = arith.constant 0 : i32
    return %c0_i32, %c0_i32_0, %c0_i32_1 : i32, i32, i32
  }
  func.func @transform_13(%arg0: i32, %arg1: i32) -> (i32, i32) {
    %c0_i32 = arith.constant 0 : i32
    %c0_i32_0 = arith.constant 0 : i32
    %c0_i32_1 = arith.constant 0 : i32
    return %c0_i32, %c0_i32_0 : i32, i32
  }
  func.func @transform_14(%arg0: i32, %arg1: i32) -> (i32, i32) {
    %c0_i32 = arith.constant 0 : i32
    %c0_i32_0 = arith.constant 0 : i32
    %c0_i32_1 = arith.constant 0 : i32
    return %c0_i32, %c0_i32_0 : i32, i32
  }
  func.func @transform_15(%arg0: i32, %arg1: i32) -> (i32, i32, i32) {
    %c0_i32 = arith.constant 0 : i32
    %c0_i32_0 = arith.constant 0 : i32
    return %arg0, %c0_i32, %arg1 : i32, i32, i32
  }
  func.func @transform_16(%arg0: i32, %arg1: i32) -> (i32, i32) {
    %c1_i32 = arith.constant 1 : i32
    %0 = arith.muli %arg0, %c1_i32 : i32
    %1 = arith.addi %0, %arg1 : i32
    %c0_i32 = arith.constant 0 : i32
    %c0_i32_0 = arith.constant 0 : i32
    return %c0_i32, %1 : i32, i32
  }
  func.func @transform_17(%arg0: i32, %arg1: i32) -> (i32, i32) {
    %c1_i32 = arith.constant 1 : i32
    %0 = arith.muli %arg0, %c1_i32 : i32
    %1 = arith.addi %0, %arg1 : i32
    %c0_i32 = arith.constant 0 : i32
    %c0_i32_0 = arith.constant 0 : i32
    return %c0_i32, %1 : i32, i32
  }
}

</mosaic_0001>

<bundles_post_ra>
// kernel: tpu_custom_call.1
= control target key start
LH: loop header
LB: loop body
LE: loop exit
PB: predicated region body
PF: predicated region fallthrough
CT: control target
= control target key end

     0   :  { %s2800_s0 = inlined_call_operand.vmem [shape: f32[2,4,256], index: 0, kind: input, shape index: {}]   ;;  %s2801_s1 = inlined_call_operand.vmem [shape: f32[2,4,256], index: 1, kind: input, shape index: {}]   ;;  %s2802_s2 = inlined_call_operand.vmem [shape: f32[2,4,256], index: 2, kind: input, shape index: {}]   ;;  %s2803_s3 = inlined_call_operand.vmem [shape: f32[4,4], index: 3, kind: input, shape index: {}]   ;;  %s2804_s4 = inlined_call_operand.vmem [shape: f32[4,1], index: 4, kind: input, shape index: {}]   ;;  %s2805_s5 = inlined_call_operand.vmem [shape: f32[4,4], index: 5, kind: input, shape index: {}]   ;;  %s2806_s6 = inlined_call_operand.vmem [shape: f32[4,1], index: 6, kind: input, shape index: {}]   ;;  %s2807_s7 = inlined_call_operand.vmem [shape: f32[24,8], index: 7, kind: input, shape index: {}]   ;;  %s2808_s8 = inlined_call_operand.vmem [shape: f32[24,1], index: 8, kind: input, shape index: {}]   ;;  %s2809_s9 = inlined_call_operand.vmem [shape: f32[24,1], index: 9, kind: input, shape index: {}]   ;;  %s2810_s10 = inlined_call_operand.vmem [shape: f32[3,24,24], index: 10, kind: input, shape index: {}]   ;;  %s2811_s11 = inlined_call_operand.vmem [shape: f32[3,24,1], index: 11, kind: input, shape index: {}]   ;;  %s2812_s12 = inlined_call_operand.vmem [shape: f32[3,24,1], index: 12, kind: input, shape index: {}]   ;;  %s2813_s13 = inlined_call_operand.vmem [shape: f32[8,24], index: 13, kind: input, shape index: {}]   ;;  %s2814_s14 = inlined_call_operand.vmem [shape: f32[8,1], index: 14, kind: input, shape index: {}]   ;;  %s2815_s15 = inlined_call_operand.hbm [shape: f32[2,4,256], index: 15, kind: output, shape index: {0}]   ;;  %s2816_s16 = inlined_call_operand.hbm [shape: f32[1,256], index: 16, kind: output, shape index: {1}]   ;;  %s2817_s17 = inlined_call_operand.hbm [shape: f32[1,256], index: 17, kind: output, shape index: {2}]  }
   0x1   :  { %2826 = sst [smem:[#allocation15_spill]] %s2800_s0 }
   0x2   :  { %2827 = sst [smem:[#allocation16_spill]] %s2801_s1 }
   0x3   :  { %2828 = sst [smem:[#allocation17_spill]] %s2802_s2 }
   0x4   :  { %2829 = sst [smem:[#allocation18_spill]] %s2803_s3 }
   0x5   :  { %2830 = sst [smem:[#allocation19_spill]] %s2804_s4 }
   0x6   :  { %2831 = sst [smem:[#allocation20_spill]] %s2817_s17 }
   0x7   :  { %23 = vsyncpa [#allocation3], 0 }
   0x8   :  { %25 = vsyncpa [#allocation3 + $0x1], 0 }
   0x9   :  { %26 = vsyncpa [#allocation5], 0 }
   0xa   :  { %28 = vsyncpa [#allocation5 + $0x1], 0  ;;  %s2424_s24 = smov 0   ;;  %s2426_s25 = smov 0  }
   0xb   :  { %s2428_s26 = smov 0   ;;  %s2430_s27 = smov 0  }
   0xc   :  { %s2432_s28 = smov 0   ;;  %s2434_s29 = smov 0  }
   0xd LB: > { %2832 = sst [smem:[#allocation9_spill]] %s2305_s24  ;;  %s2819_s0 = sadd.s32 4294967295, %s2325_s29   ;;  %s2325_s29 = sphi %s2434_s29, %s34_s29   ;;  %s2321_s28 = sphi %s2432_s28, %s2853_s28   ;;  %s2317_s27 = sphi %s2430_s27, %s2852_s27   ;;  %s2313_s26 = sphi %s2428_s26, %s2851_s26   ;;  %s2309_s25 = sphi %s2426_s25, %s2855_s25   ;;  %s2305_s24 = sphi %s2424_s24, %s2854_s24  }
   0xe   : > { %2833 = sst [smem:[#allocation10_spill]] %s2313_s26  ;;  %s2818_s30 = sadd.s32 4294967294, %s2325_s29  }
   0xf   : > { %2834 = sst [smem:[#allocation11_spill]] %s2321_s28  ;;  %s46_s18 = sadd.s32 1, %s2321_s28 }
  0x10   : > { %s391_s19 = sadd.s32 1, %s2313_s26  ;;  %p48_p0 = scmp.ge.s32.totalorder %s46_s18, 2 }
  0x11   : > { %p401_p1 = scmp.ne.s32.totalorder %s2313_s26, %s2309_s25  ;;  %p402_p2 = scmp.eq.s32.totalorder %s2819_s0, 1 }
  0x12   : > { %p407_p3 = scmp.ne.s32.totalorder %s2309_s25, %s2305_s24  ;;  %s2857_s18 = smov (%p48_p0, %s46_s18), 0 }
  0x13   : > { %2835 = sst [smem:[#allocation12_spill]] %s2857_s18  ;;  %p2466_p4 = por %p402_p2, %p401_p1 }
  0x14   : > { %p408_p5 = scmp.eq.s32.totalorder %s2818_s30, 1  ;;  %s386_s20 = ssub.s32 %s2321_s28, %s2857_s18 }
  0x15   : > { %p1965_p6 = scmp.ge.s32.totalorder %s2325_s29, 1  ;;  %p389_p7 = scmp.eq.s32.totalorder %s386_s20, 0 }
  0x16   : > { %p2475_p8 = por %p408_p5, %p407_p3  ;;  %p557_p9 = scmp.lt.s32.totalorder %s2325_s29, 3 }
  0x17   : > { %s2481_s22 = scalar_select %p389_p7, %s2313_s26, %s391_s19  }
  0x18   : > { %s2837_s21 = scalar_select %p2475_p8, 1, 0 }
  0x19   : > { %2839 = sst [smem:[#allocation14_spill]] %s2481_s22  ;;  %p558_p10 = pnand %p1965_p6, %p557_p9 }
  0x1a   : > { %2838 = sst [smem:[#allocation13_spill]] %s2837_s21  ;;  %p640_p11 = scmp.lt.s32.totalorder (!%p558_p10), %s2317_s27, 1  ;;  %v2327_v0 = vmov (!%p558_p10), 0.0   ;;  %v2328_v2 = vmov (!%p558_p10), 0   ;;  %v784_v3 = vld [vmem:[%s2808_s8] sm:$0xff] (!%p558_p10)  ;;  %vm687_vm0 = vcmask (!%p558_p10), 1043456  }
  0x1b   : > { %561 = sbr.rel (%p558_p10) target bundleno = 1808 (0x710), region = 80  ;;  %756 = vmatprep.mubr.f32.mxu0 (!%p558_p10), %v2327_v0  ;;  %s2840_s4 = sld [smem:[#allocation19_spill]] (!%p558_p10)  ;;  %876 = vmatprep.mubr.f32.mxu1 (!%p558_p10), %v2327_v0  ;;  %v895_v7 = vld [vmem:[%s2809_s9] sm:$0xff] (!%p558_p10)  ;;  %vm683_vm1 = vcmask (!%p558_p10), 31744   ;;  %v897_v11 = vld [vmem:[%s2809_s9 + $0x10] sm:$0xff] (!%p558_p10)  ;;  %v935_v12 = vld [vmem:[%s2811_s11 + $0x8] sm:$0xff] (!%p558_p10) }
  0x1c   : > { %2112 = vset.pattern.permute.xlu0 (!%p558_p10), %v2328_v2  ;;  %2113 = vset.pattern.permute.xlu1 (!%p558_p10), %v2328_v2  ;;  %s2841_s26 = sld [smem:[#allocation15_spill]] (!%p558_p10)  ;;  %s2842_s21 = sld [smem:[#allocation16_spill]] (!%p558_p10)  ;;  %v1045_v13 = vld [vmem:[%s2812_s12] sm:$0xff] (!%p558_p10)  ;;  %v1047_v14 = vld [vmem:[%s2812_s12 + $0x10] sm:$0xff] (!%p558_p10)  ;;  %v1993_v16 = vld [vmem:[%s2812_s12 + $0x18] sm:$0xff] (!%p558_p10)  ;;  %vm802_vm2 = vcmask (!%p558_p10), 64512  }
  0x1d   : > { %s2843_s3 = sld [smem:[#allocation18_spill]] (!%p558_p10)  ;;  %v1988_v15 = vld [vmem:[%s2811_s11 + $0x20] sm:$0xff] (!%p558_p10)  ;;  %v1995_v17 = vld [vmem:[%s2812_s12 + $0x28] sm:$0xff] (!%p558_p10)  ;;  %v2000_v18 = vld [vmem:[%s2811_s11 + $0x38] sm:$0xff] (!%p558_p10)  ;;  %s2844_s2 = sld [smem:[#allocation17_spill]] (!%p558_p10)  ;;  %vm952_vm3 = vcmask (!%p558_p10), 195584  }
  0x1e   : > { %v2005_v19 = vld [vmem:[%s2812_s12 + $0x30] sm:$0xff] (!%p558_p10)  ;;  %v2007_v20 = vld [vmem:[%s2812_s12 + $0x40] sm:$0xff] (!%p558_p10)  ;;  %v785_v22 = vld [vmem:[%s2808_s8 + $0x8] sm:$0xff] (!%p558_p10)  ;;  %s2680_s28 = sand.u32 (!%p558_p10), 1, %s2309_s25  }
  0x1f   : > { %v1386_v21 = vld [vmem:[%s2814_s14] sm:$0xff] (!%p558_p10)  ;;  %794 = vperm.xlu1 (!%p558_p10), %2113, %v785_v22   ;;  %v786_v23 = vld [vmem:[%s2808_s8 + $0x10] sm:$0xff] (!%p558_p10)  ;;  %v896_v24 = vld [vmem:[%s2809_s9 + $0x8] sm:$0xff] (!%p558_p10) }
  0x20   : > { %v934_v25 = vld [vmem:[%s2811_s11] sm:$0xff] (!%p558_p10)  ;;  %v936_v26 = vld [vmem:[%s2811_s11 + $0x10] sm:$0xff] (!%p558_p10)  ;;  %v1046_v27 = vld [vmem:[%s2812_s12 + $0x8] sm:$0xff] (!%p558_p10) }
  0x21   : > { %v675_v1 = vld [vmem:[%s2840_s4] sm:$0xf] (!%p558_p10)  ;;  %v1987_v28 = vld [vmem:[%s2811_s11 + $0x18] sm:$0xff] (!%p558_p10)  ;;  %v1989_v29 = vld [vmem:[%s2811_s11 + $0x28] sm:$0xff] (!%p558_p10)  ;;  %s1742_s4 = scalar_lea.sflag (!%p558_p10), [#allocation3], %s2680_s28 }
  0x22   : > { %s641_s20 = scalar_select %p640_p11, %s2317_s27, 1  ;;  %678 = vperm.xlu0 %2112, %v675_v1   ;;  %v1994_v30 = vld [vmem:[%s2812_s12 + $0x20] sm:$0xff]  ;;  %v1999_v31 = vld [vmem:[%s2811_s11 + $0x30] sm:$0xff]  ;;  %v2006_v33 = vld [vmem:[%s2812_s12 + $0x38] sm:$0xff] }
  0x23   : > { %v674_v10 = vld [vmem:[%s2843_s3] sm:$0xf]  ;;  %799 = vperm.xlu1 %2113, %v786_v23   ;;  %v782_v53 = vld [vmem:[%s2807_s7 + $0x8] sm:$0xff]  ;;  %v783_v54 = vld [vmem:[%s2807_s7 + $0x10] sm:$0xff] }
  0x24   : > { %s2490_s19 = sshll.u32 %s641_s20, 3  ;;  %v2001_v32 = vld [vmem:[%s2811_s11 + $0x40] sm:$0xff] }
  0x25   : > { %s647_s30 = scalar_lea.vmem %s2841_s26, %s2490_s19  ;;  %s657_s24 = scalar_lea.vmem %s2842_s21, %s2490_s19  ;;  %v1536_v34 = vld [vmem:[%s2806_s6] sm:$0xf] }
  0x26   : > { %v672_v4 = vld [vmem:[%s647_s30] sm:$0xff]  ;;  %789 = vperm.xlu0 %2112, %v784_v3   ;;  %s667_s17 = scalar_lea.vmem %s2844_s2, %s2490_s19  ;;  %s1966_s21 = sshll.u32 %s2680_s28, 3 }
  0x27   : > { %v1636_v5 = vld [vmem:[%s657_s24] sm:$0xff]  ;;  %v673_v6 = vand.u32 2147483647, %v672_v4  ;;  %911 = vperm.xlu1 %2113, %v896_v24   ;;  %s626_s22 = scalar_lea.vmem [#allocation2], %s1966_s21  ;;  %s2022_s30 = sshll.u32 %s2317_s27, 7 }
  0x28   : > { %v763_v35 = vld [vmem:[%s667_s17] sm:$0xff]  ;;  %s2688_s0 = scalar_lea.hbm %s2815_s15, %s2022_s30  ;;  %s1766_s18 = sshll.u32 %s626_s22, 4  ;;  %s1767_s18 = int_to_ptr.vmem [resolvable:$true] %s1766_s18 }
  0x29   : > { %v682_v8 = vcombine.high %v673_v6, %v673_v6  ;;  %v2506_v9 = vadd.f32 %v1636_v5, %v673_v6  ;;  %v765_v38 = vcombine.high %v763_v35, %v763_v35  ;;  %v781_v51 = vld [vmem:[%s2807_s7] sm:$0xff]  ;;  %s2187_s24 = scalar_lea.vmem %s1767_s18, 128  ;;  %s2331_s17 = smov [#allocation2]  }
  0x2a   : > { %906 = vperm.xlu0 %2112, %v895_v7   ;;  %p2188_p12 = scmp.ne.s32.totalorder %s1767_s18, %s2187_s24  ;;  %s2191_s19 = sshll.u32 %s2331_s17, 4  ;;  %s2192_s19 = int_to_ptr.vmem [resolvable:$false] %s2191_s19 }
  0x2b   : > { %1973 = vmatprep.subr.msk.mxu0 %vm687_vm0, %v682_v8  ;;  %939 = vperm.xlu1 %2113, %v934_v25   ;;  %1740 = vst [vmem:[%s626_s22] sm:$0xff] %v2506_v9  ;;  %s2193_s26 = scalar_lea.vmem %s2192_s19, 256  ;;  %p2194_p1 = scmp.lt.s32.totalorder %s1767_s18, %s2192_s19 }
  0x2c   : > { %1974 = vmatpush1.msk.msra.mxu0 %vm687_vm0, %v673_v6  ;;  %p2189_p13 = pnand %p2188_p12, %p2466_p4  ;;  %p2195_p2 = scmp.lt.s32.totalorder %s2193_s26, %s2187_s24 }
  0x2d   : > { %1975 = vmatmul.mubr.msk.f32.vlgmr.msra.gmra.mrb[0].mxu0 %vm683_vm1, %v674_v10 }
  0x2e   : > { %1026 = vmatprep.mubr.f32.mxu0 %v2327_v0  ;;  %916 = vperm.xlu0 %2112, %v897_v11   ;;  %p2190_p0 = pneg %p2189_p13  ;;  %p2196_p3 = por %p2195_p2, %p2194_p1 }
  0x2f   : > { %949 = vperm.xlu1 %2113, %v936_v26  }
  0x30   : > { %p2197_p5 = pnand %p2196_p3, %p2190_p0 }
  0x32   : > { %944 = vperm.xlu0 %2112, %v935_v12  }
  0x33   : > { %1061 = vperm.xlu1 %2113, %v1046_v27  }
  0x36   : > { %1056 = vperm.xlu0 %2112, %v1045_v13  }
  0x37   : > { %1091 = vperm.xlu1 %2113, %v1987_v28  }
  0x3a   : > { %1066 = vperm.xlu0 %2112, %v1047_v14  }
  0x3b   : > { %1101 = vperm.xlu1 %2113, %v1989_v29  }
  0x3e   : > { %1096 = vperm.xlu0 %2112, %v1988_v15  }
  0x3f   : > { %1213 = vperm.xlu1 %2113, %v1994_v30  }
  0x42   : > { %1208 = vperm.xlu0 %2112, %v1993_v16  }
  0x43   : > { %1243 = vperm.xlu1 %2113, %v1999_v31   ;;  %v931_v31 = vld [vmem:[%s2810_s10] sm:$0xff] }
  0x46   : > { %1218 = vperm.xlu0 %2112, %v1995_v17  }
  0x47   : > { %1253 = vperm.xlu1 %2113, %v2001_v32   ;;  %v932_v32 = vld [vmem:[%s2810_s10 + $0x8] sm:$0xff] }
  0x4a   : > { %1248 = vperm.xlu0 %2112, %v2000_v18  }
  0x4b   : > { %1365 = vperm.xlu1 %2113, %v2006_v33   ;;  %v933_v33 = vld [vmem:[%s2810_s10 + $0x10] sm:$0xff] }
  0x4e   : > { %1360 = vperm.xlu0 %2112, %v2005_v19  }
  0x4f   : > { %1539 = vperm.xlu1 %2113, %v1536_v34  }
  0x52   : > { %1370 = vperm.xlu0 %2112, %v2007_v20  }
  0x56   : > { %1389 = vperm.xlu0 %2112, %v1386_v21  }
  0x9e   : > { %v795_v59 = vpop.permute.xlu1 %794 }
  0xa1   : > { %v679_v36 = vpop.permute.xlu0 %678 }
  0xa2   : > { %v800_v2 = vpop.permute.xlu1 %799 }
  0xa5   : > { %v790_v55 = vpop.permute.xlu0 %789 }
  0xa6   : > { %v912_v13 = vpop.permute.xlu1 %911 }
  0xa9   : > { %v907_v10 = vpop.permute.xlu0 %906 }
  0xaa   : > { %v940_v34 = vpop.permute.xlu1 %939 }
  0xad   : > { %v917_v24 = vpop.permute.xlu0 %916 }
 0x100   : > { %v758_v37 = vpop.f32.mrb[0].mxu0 }
 0x101   : > { %v759_v39 = vadd.f32 %v758_v37, %v679_v36  ;;  %v760_v40 = vpop.f32.mrb[1].mxu0 }
 0x102   : > { %v761_v41 = vadd.f32 %v760_v40, %v679_v36 }
 0x103   : > { %v2591_v42 = vadd.f32 %v763_v35, %v759_v39  ;;  %v945_v39 = vpop.permute.xlu0 %944 }
 0x104   : > { %v2593_v43 = vadd.f32 %v765_v38, %v761_v41 }
 0x105   : > { %v771_v44 = vadd.f32 0.5, %v2591_v42  ;;  %v1976_v49 = vadd.f32 -0.5, %v2591_v42 }
 0x106   : > { %v772_v45 = vadd.f32 0.5, %v2593_v43  ;;  %v1977_v47 = vadd.f32 -0.5, %v2593_v43 }
 0x107   : > { %v775_v46 = vrot.slane %v771_v44, 4 }
 0x108   : > { %v776_v48 = vrot.slane %v772_v45, 4 }
 0x109   : > { %v779_v52 = vsel %vm687_vm0, %v1976_v49, %v775_v46  ;;  %v950_v46 = vpop.permute.xlu1 %949 }
 0x10a   : > { %v780_v50 = vsel %vm687_vm0, %v1977_v47, %v776_v48 }
 0x10b   : > { %812 = vmatprep.subr.mxu1 %v780_v50 }
 0x10c   : > { %813 = vmatpush1.msra.mxu1 %v779_v52 }
 0x10d   : > { %1978 = vmatmul.mubr.msk.f32.vlgmr.msra.gmra.mrb[0].mxu1 %vm802_vm2, %v781_v51 }
 0x10e   : > { %882 = vmatprep.mubr.f32.mxu1 %v2327_v0 }
 0x111   : > { %1979 = vmatmul.mubr.msk.f32.gmra.mrb[2].mxu1 %vm802_vm2, %v782_v53  ;;  %v1057_v53 = vpop.permute.xlu0 %1056 }
 0x112   : > { %888 = vmatprep.mubr.f32.mxu1 %v2327_v0 }
 0x115   : > { %1980 = vmatmul.mubr.msk.f32.gmra.mrb[4].mxu1 %vm802_vm2, %v783_v54 }
 0x116   : > { %1177 = vmatprep.mubr.f32.mxu1 %v2327_v0 }
 0x1e0   : > { %v878_v56 = vpop.f32.mrb[0].mxu1 }
 0x1e1   : > { %v879_v57 = vadd.f32 %v878_v56, %v790_v55  ;;  %v880_v58 = vpop.f32.mrb[1].mxu1  ;;  %v1062_v56 = vpop.permute.xlu1 %1061 }
 0x1e2   : > { %v881_v60 = vadd.f32 %v880_v58, %v790_v55 }
 0x1e3   : > { %2115 = vtanh.f32 %v879_v57 }
 0x1e4   : > { %2117 = vtanh.f32 %v881_v60  ;;  %v884_v61 = vpop.f32.mrb[2].mxu1 }
 0x1e5   : > { %v885_v62 = vadd.f32 %v884_v61, %v795_v59  ;;  %v886_v63 = vpop.f32.mrb[3].mxu1 }
 0x1e6   : > { %v887_v1 = vadd.f32 %v886_v63, %v795_v59 }
 0x1e7   : > { %2119 = vtanh.f32 %v885_v62 }
 0x1e8   : > { %2121 = vtanh.f32 %v887_v1  ;;  %v890_v3 = vpop.f32.mrb[4].mxu1 }
 0x1e9   : > { %v891_v4 = vadd.f32 %v890_v3, %v800_v2  ;;  %v892_v5 = vpop.f32.mrb[5].mxu1 }
 0x1ea   : > { %v893_v6 = vadd.f32 %v892_v5, %v800_v2 }
 0x1eb   : > { %2123 = vtanh.f32 %v891_v4 }
 0x1ec   : > { %2125 = vtanh.f32 %v893_v6 }
 0x1ed   : > { %v2116_v7 = vpop.eup %2115 }
 0x1ee   : > { %v2118_v8 = vpop.eup %2117  ;;  %v919_v11 = vmul.f32 %v2116_v7, %v907_v10 }
 0x1ef   : > { %v920_v14 = vmul.f32 %v2118_v8, %v907_v10 }
 0x1f0   : > { %v925_v18 = vadd.f32 %v919_v11, %v879_v57 }
 0x1f1   : > { %v2120_v12 = vpop.eup %2119  ;;  %v926_v21 = vadd.f32 %v920_v14, %v881_v60  ;;  %v1986_v14 = vld [vmem:[%s2810_s10 + $0x28] sm:$0xff] }
 0x1f2   : > { %v2122_v15 = vpop.eup %2121  ;;  %v921_v16 = vmul.f32 %v2120_v12, %v912_v13  ;;  %v1984_v12 = vld [vmem:[%s2810_s10 + $0x18] sm:$0xff] }
 0x1f3   : > { %v922_v17 = vmul.f32 %v2122_v15, %v912_v13  ;;  %v1985_v13 = vld [vmem:[%s2810_s10 + $0x20] sm:$0xff]  ;;  %v1092_v15 = vpop.permute.xlu1 %1091 }
 0x1f4   : > { %v927_v19 = vadd.f32 %v921_v16, %v885_v62 }
 0x1f5   : > { %v2124_v20 = vpop.eup %2123  ;;  %v928_v22 = vadd.f32 %v922_v17, %v887_v1 }
 0x1f6   : > { %v2126_v23 = vpop.eup %2125  ;;  %v2025_v25 = vpack.c.bf16 %v927_v19, %v925_v18  ;;  %v923_v28 = vmul.f32 %v2124_v20, %v917_v24 }
 0x1f7   : > { %v924_v26 = vmul.f32 %v2126_v23, %v917_v24  ;;  %v2023_v27 = vpack.c.bf16 %v928_v22, %v926_v21 }
 0x1f8   : > { %v929_v30 = vadd.f32 %v923_v28, %v891_v4  ;;  %v1067_v4 = vpop.permute.xlu0 %1066 }
 0x1f9   : > { %v930_v29 = vadd.f32 %v924_v26, %v893_v6  ;;  %2024 = vmatprep.subr.bf16.mxu0 %v2023_v27 }
 0x1fa   : > { %2026 = vmatpush1.bf16.msra.mxu0 %v2025_v25  ;;  %v1102_v25 = vpop.permute.xlu1 %1101 }
 0x1fb   : > { %966 = vmatprep.subr.mxu0 %v930_v29 }
 0x1fc   : > { %v1097_v20 = vpop.permute.xlu0 %1096 }
 0x1fe   : > { %967 = vmatpush1.msra.mxu0 %v929_v30 }
 0x1ff   : > { %1981 = vmatmul.mubr.msk.f32.vlgmr.msra.gmra.mrb[2].mxu0 %vm952_vm3, %v931_v31 }
 0x200   : > { %1032 = vmatprep.mubr.f32.mxu0 %v2327_v0 }
 0x203   : > { %1982 = vmatmul.mubr.msk.f32.gmra.mrb[4].mxu0 %vm952_vm3, %v932_v32  ;;  %v1209_v32 = vpop.permute.xlu0 %1208 }
 0x204   : > { %1038 = vmatprep.mubr.f32.mxu0 %v2327_v0 }
 0x207   : > { %1983 = vmatmul.mubr.msk.f32.gmra.mrb[6].mxu0 %vm952_vm3, %v933_v33 }
 0x208   : > { %1329 = vmatprep.mubr.f32.mxu0 %v2327_v0 }
 0x2d2   : > { %v1028_v35 = vpop.f32.mrb[2].mxu0 }
 0x2d3   : > { %v1029_v36 = vadd.f32 %v1028_v35, %v940_v34  ;;  %v1030_v37 = vpop.f32.mrb[3].mxu0  ;;  %v1214_v35 = vpop.permute.xlu1 %1213 }
 0x2d4   : > { %v1031_v38 = vadd.f32 %v1030_v37, %v940_v34 }
 0x2d5   : > { %2127 = vtanh.f32 %v1029_v36 }
 0x2d6   : > { %2129 = vtanh.f32 %v1031_v38  ;;  %v1034_v40 = vpop.f32.mrb[4].mxu0 }
 0x2d7   : > { %v1035_v41 = vadd.f32 %v1034_v40, %v945_v39  ;;  %v1036_v44 = vpop.f32.mrb[5].mxu0 }
 0x2d8   : > { %v1037_v45 = vadd.f32 %v1036_v44, %v945_v39 }
 0x2d9   : > { %2131 = vtanh.f32 %v1035_v41 }
 0x2da   : > { %2133 = vtanh.f32 %v1037_v45  ;;  %v1040_v47 = vpop.f32.mrb[6].mxu0 }
 0x2db   : > { %v1041_v48 = vadd.f32 %v1040_v47, %v950_v46  ;;  %v1042_v49 = vpop.f32.mrb[7].mxu0 }
 0x2dc   : > { %v1043_v50 = vadd.f32 %v1042_v49, %v950_v46 }
 0x2dd   : > { %2135 = vtanh.f32 %v1041_v48 }
 0x2de   : > { %2137 = vtanh.f32 %v1043_v50 }
 0x2df   : > { %v2128_v51 = vpop.eup %2127 }
 0x2e0   : > { %v2130_v52 = vpop.eup %2129  ;;  %v1069_v54 = vmul.f32 %v2128_v51, %v1057_v53 }
 0x2e1   : > { %v1070_v57 = vmul.f32 %v2130_v52, %v1057_v53 }
 0x2e2   : > { %v1075_v61 = vadd.f32 %v1069_v54, %v1029_v36 }
 0x2e3   : > { %v2132_v55 = vpop.eup %2131  ;;  %v1076_v1 = vadd.f32 %v1070_v57, %v1031_v38  ;;  %v1998_v57 = vld [vmem:[%s2810_s10 + $0x40] sm:$0xff] }
 0x2e4   : > { %v2134_v58 = vpop.eup %2133  ;;  %v1071_v59 = vmul.f32 %v2132_v55, %v1062_v56  ;;  %v1996_v55 = vld [vmem:[%s2810_s10 + $0x30] sm:$0xff] }
 0x2e5   : > { %v1072_v60 = vmul.f32 %v2134_v58, %v1062_v56  ;;  %v1997_v56 = vld [vmem:[%s2810_s10 + $0x38] sm:$0xff]  ;;  %v1244_v58 = vpop.permute.xlu1 %1243 }
 0x2e6   : > { %v1077_v62 = vadd.f32 %v1071_v59, %v1035_v41 }
 0x2e7   : > { %v2136_v63 = vpop.eup %2135  ;;  %v1078_v2 = vadd.f32 %v1072_v60, %v1037_v45 }
 0x2e8   : > { %v2138_v3 = vpop.eup %2137  ;;  %v2029_v5 = vpack.c.bf16 %v1077_v62, %v1075_v61  ;;  %v1073_v8 = vmul.f32 %v2136_v63, %v1067_v4 }
 0x2e9   : > { %v1074_v6 = vmul.f32 %v2138_v3, %v1067_v4  ;;  %v2027_v7 = vpack.c.bf16 %v1078_v2, %v1076_v1 }
 0x2ea   : > { %v1079_v11 = vadd.f32 %v1073_v8, %v1041_v48  ;;  %v1219_v48 = vpop.permute.xlu0 %1218 }
 0x2eb   : > { %v1080_v10 = vadd.f32 %v1074_v6, %v1043_v50  ;;  %2028 = vmatprep.subr.bf16.mxu1 %v2027_v7 }
 0x2ec   : > { %2030 = vmatpush1.bf16.msra.mxu1 %v2029_v5  ;;  %v1254_v5 = vpop.permute.xlu1 %1253 }
 0x2ed   : > { %1117 = vmatprep.subr.mxu1 %v1080_v10 }
 0x2ee   : > { %v1249_v63 = vpop.permute.xlu0 %1248 }
 0x2f0   : > { %1118 = vmatpush1.msra.mxu1 %v1079_v11 }
 0x2f1   : > { %1990 = vmatmul.mubr.msk.f32.vlgmr.msra.gmra.mrb[6].mxu1 %vm952_vm3, %v1984_v12 }
 0x2f2   : > { %1183 = vmatprep.mubr.f32.mxu1 %v2327_v0 }
 0x2f5   : > { %1991 = vmatmul.mubr.msk.f32.gmra.mrb[8].mxu1 %vm952_vm3, %v1985_v13  ;;  %v1361_v13 = vpop.permute.xlu0 %1360 }
 0x2f6   : > { %1189 = vmatprep.mubr.f32.mxu1 %v2327_v0 }
 0x2f9   : > { %1992 = vmatmul.mubr.msk.f32.gmra.mrb[10].mxu1 %vm952_vm3, %v1986_v14 }
 0x2fa   : > { %1459 = vmatprep.mubr.f32.mxu1 %v2327_v0 }
 0x3c4   : > { %v1179_v16 = vpop.f32.mrb[6].mxu1 }
 0x3c5   : > { %v1180_v17 = vadd.f32 %v1179_v16, %v1092_v15  ;;  %v1181_v18 = vpop.f32.mrb[7].mxu1  ;;  %v1366_v16 = vpop.permute.xlu1 %1365 }
 0x3c6   : > { %v1182_v19 = vadd.f32 %v1181_v18, %v1092_v15 }
 0x3c7   : > { %2139 = vtanh.f32 %v1180_v17 }
 0x3c8   : > { %2141 = vtanh.f32 %v1182_v19  ;;  %v1185_v21 = vpop.f32.mrb[8].mxu1 }
 0x3c9   : > { %v1186_v22 = vadd.f32 %v1185_v21, %v1097_v20  ;;  %v1187_v23 = vpop.f32.mrb[9].mxu1 }
 0x3ca   : > { %v1188_v24 = vadd.f32 %v1187_v23, %v1097_v20 }
 0x3cb   : > { %2143 = vtanh.f32 %v1186_v22 }
 0x3cc   : > { %2145 = vtanh.f32 %v1188_v24  ;;  %v1191_v26 = vpop.f32.mrb[10].mxu1 }
 0x3cd   : > { %v1192_v27 = vadd.f32 %v1191_v26, %v1102_v25  ;;  %v1193_v28 = vpop.f32.mrb[11].mxu1 }
 0x3ce   : > { %v1194_v29 = vadd.f32 %v1193_v28, %v1102_v25 }
 0x3cf   : > { %2147 = vtanh.f32 %v1192_v27 }
 0x3d0   : > { %2149 = vtanh.f32 %v1194_v29 }
 0x3d1   : > { %v2140_v30 = vpop.eup %2139 }
 0x3d2   : > { %v2142_v31 = vpop.eup %2141  ;;  %v1221_v33 = vmul.f32 %v2140_v30, %v1209_v32 }
 0x3d3   : > { %v1222_v36 = vmul.f32 %v2142_v31, %v1209_v32 }
 0x3d4   : > { %v1227_v40 = vadd.f32 %v1221_v33, %v1180_v17 }
 0x3d5   : > { %v2144_v34 = vpop.eup %2143  ;;  %v1228_v45 = vadd.f32 %v1222_v36, %v1182_v19 }
 0x3d6   : > { %v2146_v37 = vpop.eup %2145  ;;  %v1223_v38 = vmul.f32 %v2144_v34, %v1214_v35  ;;  %v1385_v34 = vld [vmem:[%s2813_s13] sm:$0xff] }
 0x3d7   : > { %v1224_v39 = vmul.f32 %v2146_v37, %v1214_v35  ;;  %v1535_v35 = vld [vmem:[%s2805_s5] sm:$0xf] }
 0x3d8   : > { %v1229_v41 = vadd.f32 %v1223_v38, %v1186_v22 }
 0x3d9   : > { %v2148_v44 = vpop.eup %2147  ;;  %v1230_v46 = vadd.f32 %v1224_v39, %v1188_v24 }
 0x3da   : > { %v2150_v47 = vpop.eup %2149  ;;  %v2033_v49 = vpack.c.bf16 %v1229_v41, %v1227_v40  ;;  %v1225_v52 = vmul.f32 %v2148_v44, %v1219_v48  ;;  %v1540_v44 = vpop.permute.xlu1 %1539 }
 0x3db   : > { %v1226_v50 = vmul.f32 %v2150_v47, %v1219_v48  ;;  %v2031_v51 = vpack.c.bf16 %v1230_v46, %v1228_v45 }
 0x3dc   : > { %v1231_v54 = vadd.f32 %v1225_v52, %v1192_v27  ;;  %v1371_v27 = vpop.permute.xlu0 %1370 }
 0x3dd   : > { %v1232_v53 = vadd.f32 %v1226_v50, %v1194_v29  ;;  %2032 = vmatprep.subr.bf16.mxu0 %v2031_v51  ;;  %v2329_v50 = vmov 1.0  }
 0x3de   : > { %2034 = vmatpush1.bf16.msra.mxu0 %v2033_v49 }
 0x3df   : > { %1269 = vmatprep.subr.mxu0 %v1232_v53 }
 0x3e0   : > { %v1390_v36 = vpop.permute.xlu0 %1389 }
 0x3e2   : > { %1270 = vmatpush1.msra.mxu0 %v1231_v54 }
 0x3e3   : > { %2002 = vmatmul.mubr.msk.f32.vlgmr.msra.gmra.mrb[8].mxu0 %vm952_vm3, %v1996_v55 }
 0x3e4   : > { %1335 = vmatprep.mubr.f32.mxu0 %v2327_v0 }
 0x3e7   : > { %2003 = vmatmul.mubr.msk.f32.gmra.mrb[10].mxu0 %vm952_vm3, %v1997_v56 }
 0x3e8   : > { %1341 = vmatprep.mubr.f32.mxu0 %v2327_v0 }
 0x3eb   : > { %2004 = vmatmul.mubr.msk.f32.gmra.mrb[12].mxu0 %vm952_vm3, %v1998_v57 }
 0x4b6   : > { %v1331_v59 = vpop.f32.mrb[8].mxu0 }
 0x4b7   : > { %v1332_v60 = vadd.f32 %v1331_v59, %v1244_v58  ;;  %v1333_v61 = vpop.f32.mrb[9].mxu0 }
 0x4b8   : > { %v1334_v62 = vadd.f32 %v1333_v61, %v1244_v58 }
 0x4b9   : > { %2151 = vtanh.f32 %v1332_v60 }
 0x4ba   : > { %2153 = vtanh.f32 %v1334_v62  ;;  %v1337_v1 = vpop.f32.mrb[10].mxu0 }
 0x4bb   : > { %v1338_v2 = vadd.f32 %v1337_v1, %v1249_v63  ;;  %v1339_v3 = vpop.f32.mrb[11].mxu0 }
 0x4bc   : > { %v1340_v4 = vadd.f32 %v1339_v3, %v1249_v63 }
 0x4bd   : > { %2155 = vtanh.f32 %v1338_v2 }
 0x4be   : > { %2157 = vtanh.f32 %v1340_v4  ;;  %v1343_v6 = vpop.f32.mrb[12].mxu0 }
 0x4bf   : > { %v1344_v7 = vadd.f32 %v1343_v6, %v1254_v5  ;;  %v1345_v8 = vpop.f32.mrb[13].mxu0 }
 0x4c0   : > { %v1346_v10 = vadd.f32 %v1345_v8, %v1254_v5 }
 0x4c1   : > { %2159 = vtanh.f32 %v1344_v7 }
 0x4c2   : > { %2161 = vtanh.f32 %v1346_v10 }
 0x4c3   : > { %v2152_v11 = vpop.eup %2151 }
 0x4c4   : > { %v2154_v12 = vpop.eup %2153  ;;  %v1373_v14 = vmul.f32 %v2152_v11, %v1361_v13 }
 0x4c5   : > { %v1374_v17 = vmul.f32 %v2154_v12, %v1361_v13 }
 0x4c6   : > { %v1379_v21 = vadd.f32 %v1373_v14, %v1332_v60 }
 0x4c7   : > { %v2156_v15 = vpop.eup %2155  ;;  %v1380_v24 = vadd.f32 %v1374_v17, %v1334_v62 }
 0x4c8   : > { %v2158_v18 = vpop.eup %2157  ;;  %v1375_v19 = vmul.f32 %v2156_v15, %v1366_v16 }
 0x4c9   : > { %v1376_v20 = vmul.f32 %v2158_v18, %v1366_v16 }
 0x4ca   : > { %v1381_v22 = vadd.f32 %v1375_v19, %v1338_v2 }
 0x4cb   : > { %v2160_v23 = vpop.eup %2159  ;;  %v1382_v25 = vadd.f32 %v1376_v20, %v1340_v4 }
 0x4cc   : > { %v2162_v26 = vpop.eup %2161  ;;  %v2037_v28 = vpack.c.bf16 %v1381_v22, %v1379_v21  ;;  %v1377_v31 = vmul.f32 %v2160_v23, %v1371_v27 }
 0x4cd   : > { %v1378_v29 = vmul.f32 %v2162_v26, %v1371_v27  ;;  %v2035_v30 = vpack.c.bf16 %v1382_v25, %v1380_v24 }
 0x4ce   : > { %v1383_v33 = vadd.f32 %v1377_v31, %v1344_v7 }
 0x4cf   : > { %v1384_v32 = vadd.f32 %v1378_v29, %v1346_v10  ;;  %2036 = vmatprep.subr.bf16.mxu1 %v2035_v30  ;;  %v1638_v10 = vand.u32 2147483647, %v2506_v9 }
 0x4d0   : > { %2038 = vmatpush1.bf16.msra.mxu1 %v2037_v28 }
 0x4d1   : > { %1399 = vmatprep.subr.mxu1 %v1384_v32  ;;  %v1639_v16 = vsub.f32 0.5, %v1638_v10  ;;  %v1645_v17 = vsub.f32 -0.5, %v1638_v10 }
 0x4d4   : > { %1400 = vmatpush1.msra.mxu1 %v1383_v33 }
 0x4d5   : > { %2008 = vmatmul.mubr.msk.f32.vlgmr.msra.gmra.mrb[12].mxu1 %vm952_vm3, %v1385_v34  ;;  %2009 = vmatprep.subr.msk.mxu1 %vm687_vm0, %v2593_v43 }
 0x4d6   : > { %2010 = vmatpush1.msk.msra.mxu1 %vm687_vm0, %v2591_v42  ;;  %1615 = vmatprep.mubr.f32.mxu1 %v2327_v0 }
 0x4d9   : > { %2011 = vmatmul.mubr.msk.f32.vlgmr.msra.gmra.mrb[14].mxu1 %vm683_vm1, %v1535_v35 }
 0x5a8   : > { %v1461_v37 = vpop.f32.mrb[12].mxu1 }
 0x5a9   : > { %v1462_v38 = vadd.f32 %v1461_v37, %v1390_v36  ;;  %v1463_v39 = vpop.f32.mrb[13].mxu1 }
 0x5aa   : > { %v1464_v40 = vadd.f32 %v1463_v39, %v1390_v36 }
 0x5ab   : > { %v1468_v41 = vrot.slane %v1462_v38, 4 }
 0x5ac   : > { %v1469_v45 = vrot.slane %v1464_v40, 4  ;;  %v1617_v43 = vpop.f32.mrb[14].mxu1 }
 0x5ad   : > { %v1472_v46 = vadd.f32 %v1468_v41, %v1462_v38  ;;  %v1618_v47 = vadd.f32 %v1617_v43, %v1540_v44  ;;  %v1619_v42 = vpop.f32.mrb[15].mxu1 }
 0x5ae   : > { %v1473_v48 = vadd.f32 %v1469_v45, %v1464_v40  ;;  %v1620_v0 = vadd.f32 %v1619_v42, %v1540_v44 }
 0x5af   : > { %vm1474_vm4 = vcmp.gt.f32.partialorder %v1472_v46, 0.0  ;;  %v1622_v49 = vmax.f32 %v1618_v47, 0.0 }
 0x5b0   : > { %v1476_v51 = vsel %vm1474_vm4, -1.0, %v2329_v50  ;;  %vm1475_vm5 = vcmp.gt.f32.partialorder %v1473_v48, 0.0  ;;  %v1623_v52 = vmax.f32 %v1620_v0, 0.0 }
 0x5b1   : > { %v1480_v53 = vrot.slane %v1476_v51, 4  ;;  %v1477_v54 = vsel %vm1475_vm5, -1.0, %v2329_v50  ;;  %v1624_v55 = vmin.f32 %v1622_v49, 63.0 }
 0x5b2   : > { %v1481_v56 = vrot.slane %v1477_v54, 4  ;;  %v1625_v57 = vmin.f32 %v1623_v52, 63.0 }
 0x5b3   : > { %v1484_v58 = vsel %vm687_vm0, %v1476_v51, %v1480_v53  ;;  %v1626_v59 = vmul.f32 0.1230548, %v1624_v55 }
 0x5b4   : > { %v1486_v60 = vmul.f32 %v1484_v58, %v1462_v38  ;;  %v1485_v61 = vsel %vm687_vm0, %v1477_v54, %v1481_v56  ;;  %v1627_v62 = vmul.f32 0.1230548, %v1625_v57 }
 0x5b5   : > { %v1487_v63 = vmul.f32 %v1485_v61, %v1464_v40  ;;  %v1628_v1 = vadd.f32 -2.207275, %v1626_v59 }
 0x5b6   : > { %v1488_v2 = vmul.f32 0.5, %v1486_v60  ;;  %v1629_v3 = vadd.f32 -2.207275, %v1627_v62 }
 0x5b7   : > { %v1489_v4 = vmul.f32 0.5, %v1487_v63  ;;  %v1630_v5 = vsub.f32 0.0, %v1628_v1 }
 0x5b8   : > { %2163 = vtanh.f32 %v1488_v2  ;;  %v1631_v6 = vsub.f32 0.0, %v1629_v3 }
 0x5b9   : > { %2165 = vtanh.f32 %v1489_v4  ;;  %v1632_v7 = vmul.f32 1.442695, %v1630_v5 }
 0x5ba   : > { %v1634_v8 = vmul.f32 1.442695, %v1631_v6 }
 0x5bb   : > { %2167 = vpow2.f32 %v1632_v7 }
 0x5bc   : > { %2169 = vpow2.f32 %v1634_v8 }
 0x5c2   : > { %v2164_v11 = vpop.eup %2163 }
 0x5c3   : > { %v2166_v12 = vpop.eup %2165  ;;  %v1492_v13 = vadd.f32 1.0, %v2164_v11 }
 0x5c4   : > { %v1493_v14 = vadd.f32 1.0, %v2166_v12 }
 0x5c5   : > { %v2168_v15 = vpop.eup %2167  ;;  %v1494_v18 = vmul.f32 0.5, %v1492_v13 }
 0x5c6   : > { %v2170_v19 = vpop.eup %2169  ;;  %v1495_v20 = vmul.f32 0.5, %v1493_v14 }
 0x5c7   : > { %v1498_v21 = vrot.slane %v1494_v18, 4  ;;  %v1642_v22 = vcombine.low %v2168_v15, %v2170_v19 }
 0x5c8   : > { %v1499_v23 = vrot.slane %v1495_v20, 4 }
 0x5c9   : > { %v1644_v24 = vmul.f32 %v1642_v22, %v1639_v16  ;;  %v1646_v25 = vmul.f32 %v1645_v17, %v1642_v22  ;;  %v1502_v26 = vsub.f32 %v1494_v18, %v1498_v21 }
 0x5ca   : > { %v1503_v27 = vsub.f32 %v1495_v20, %v1499_v23  ;;  %v2330_v23 = vmov -1.0  }
 0x5cb   : > { %v1648_v28 = vcombine.high %v1644_v24, %v1644_v24  ;;  %v1651_v29 = vcombine.low %v1646_v25, %v1646_v25  ;;  %v1504_v30 = vand.u32 2147483647, %v1502_v26 }
 0x5cc   : > { %v1505_v31 = vand.u32 2147483647, %v1503_v27 }
 0x5cd   : > { %v1506_v32 = vmax.f32 %v1504_v30, 1e-09  ;;  %v1653_v33 = vsel %vm687_vm0, %v1644_v24, %v1651_v29  ;;  %v1654_v34 = vsel %vm687_vm0, %v1648_v28, %v1646_v25 }
 0x5ce   : > { %v1507_v35 = vmax.f32 %v1505_v31, 1e-09  ;;  %v1655_v36 = vmul.f32 0.70710677, %v1653_v33  ;;  %v1656_v37 = vmul.f32 0.70710677, %v1654_v34 }
 0x5cf   : > { %2171 = vlog2.f32 %v1506_v32 }
 0x5d0   : > { %2173 = vlog2.f32 %v1507_v35  ;;  %v1661_v38 = vand.u32 2147483647, %v1655_v36  ;;  %v1662_v39 = vand.u32 2147483647, %v1656_v37  ;;  %vm1657_vm6 = vcmp.ge.f32.partialorder %v1655_v36, 0.0 }
 0x5d1   : > { %vm1658_vm7 = vcmp.ge.f32.partialorder %v1656_v37, 0.0  ;;  %v1659_v24 = vsel %vm1657_vm6, 1.0, %v2330_v23 }
 0x5d2   : > { %v1663_v40 = vmul.f32 0.3275911, %v1661_v38  ;;  %v1664_v41 = vmul.f32 0.3275911, %v1662_v39  ;;  %v1689_v0 = vsub.f32 0.0, %v1661_v38  ;;  %v1690_v50 = vsub.f32 0.0, %v1662_v39 }
 0x5d3   : > { %v1660_v26 = vsel %vm1658_vm7, 1.0, %v2330_v23 }
 0x5d4   : > { %v1665_v44 = vadd.f32 1.0, %v1663_v40  ;;  %v1666_v45 = vadd.f32 1.0, %v1664_v41  ;;  %v1691_v55 = vmul.f32 %v1689_v0, %v1661_v38  ;;  %v1692_v59 = vmul.f32 %v1690_v50, %v1662_v39 }
 0x5d6   : > { %2175 = vrcp.f32 %v1665_v44  ;;  %v1693_v1 = vmul.f32 1.442695, %v1691_v55  ;;  %v1695_v3 = vmul.f32 1.442695, %v1692_v59 }
 0x5d7   : > { %2177 = vrcp.f32 %v1666_v45 }
 0x5d8   : > { %2179 = vpow2.f32 %v1693_v1 }
 0x5d9   : > { %v2172_v43 = vpop.eup %2171  ;;  %2181 = vpow2.f32 %v1695_v3 }
 0x5da   : > { %v2174_v46 = vpop.eup %2173  ;;  %v1509_v47 = vmul.f32 0.6931472, %v2172_v43 }
 0x5db   : > { %v1511_v42 = vmul.f32 0.6931472, %v2174_v46 }
 0x5dc   : > { %v1512_v48 = vsub.f32 0.0, %v1509_v47 }
 0x5dd   : > { %v1513_v49 = vsub.f32 0.0, %v1511_v42 }
 0x5de   : > { %v1516_v51 = vrot.slane %v1512_v48, 4 }
 0x5df   : > { %v1517_v52 = vrot.slane %v1513_v49, 4 }
 0x5e0   : > { %v2176_v53 = vpop.eup %2175  ;;  %v1520_v54 = vsel %vm687_vm0, %v1516_v51, 0.0 }
 0x5e1   : > { %v2178_v56 = vpop.eup %2177  ;;  %v1521_v57 = vsel %vm687_vm0, %v1517_v52, 0.0  ;;  %v1671_v58 = vmul.f32 1.0614054, %v2176_v53 }
 0x5e2   : > { %v1522_v60 = vadd.f32 %v1521_v57, %v1520_v54  ;;  %v1672_v61 = vmul.f32 1.0614054, %v2178_v56  ;;  %v2180_v17 = vpop.eup %2179 }
 0x5e3   : > { %v1673_v62 = vadd.f32 -1.4531521, %v1671_v58  ;;  %v2182_v19 = vpop.eup %2181 }
 0x5e4   : > { %1523 = vadd.xlane.f32.xlu1 %v1522_v60  ;;  %v1674_v63 = vadd.f32 -1.4531521, %v1672_v61 }
 0x5e5   : > { %v1675_v2 = vmul.f32 %v2176_v53, %v1673_v62 }
 0x5e6   : > { %v1676_v4 = vmul.f32 %v2178_v56, %v1674_v63 }
 0x5e7   : > { %v1677_v5 = vadd.f32 1.4214138, %v1675_v2 }
 0x5e8   : > { %v1678_v6 = vadd.f32 1.4214138, %v1676_v4 }
 0x5e9   : > { %v1679_v7 = vmul.f32 %v2176_v53, %v1677_v5 }
 0x5ea   : > { %v1680_v8 = vmul.f32 %v2178_v56, %v1678_v6 }
 0x5eb   : > { %v1681_v10 = vadd.f32 -0.28449672, %v1679_v7 }
 0x5ec   : > { %v1682_v11 = vadd.f32 -0.28449672, %v1680_v8 }
 0x5ed   : > { %v1683_v12 = vmul.f32 %v2176_v53, %v1681_v10 }
 0x5ee   : > { %v1684_v13 = vmul.f32 %v2178_v56, %v1682_v11 }
 0x5ef   : > { %v1685_v14 = vadd.f32 0.2548296, %v1683_v12 }
 0x5f0   : > { %v1686_v15 = vadd.f32 0.2548296, %v1684_v13 }
 0x5f1   : > { %v1687_v16 = vmul.f32 %v2176_v53, %v1685_v14 }
 0x5f2   : > { %v1688_v18 = vmul.f32 %v2178_v56, %v1686_v15 }
 0x5f3   : > { %v1697_v20 = vmul.f32 %v2180_v17, %v1687_v16 }
 0x5f4   : > { %v1698_v21 = vmul.f32 %v2182_v19, %v1688_v18 }
 0x5f5   : > { %v1699_v22 = vsub.f32 1.0, %v1697_v20 }
 0x5f6   : > { %v1700_v25 = vsub.f32 1.0, %v1698_v21 }
 0x5f7   : > { %v1701_v27 = vmul.f32 %v1699_v22, %v1659_v24 }
 0x5f8   : > { %v1702_v28 = vmul.f32 %v1700_v25, %v1660_v26 }
 0x5f9   : > { %v1703_v29 = vadd.f32 1.0, %v1701_v27 }
 0x5fa   : > { %v1704_v30 = vadd.f32 1.0, %v1702_v28 }
 0x5fb   : > { %v1705_v31 = vmul.f32 0.5, %v1703_v29 }
 0x5fc   : > { %v1706_v32 = vmul.f32 0.5, %v1704_v30 }
 0x5fd   : > { %v1709_v33 = vrot.slane %v1705_v31, 4 }
 0x5fe   : > { %v1710_v34 = vrot.slane %v1706_v32, 4 }
 0x5ff   : > { %v1713_v35 = vsub.f32 %v1705_v31, %v1709_v33 }
 0x600   : > { %v1714_v38 = vsub.f32 %v1706_v32, %v1710_v34 }
 0x601   : > { %v1715_v39 = vand.u32 2147483647, %v1713_v35 }
 0x602   : > { %v1716_v36 = vand.u32 2147483647, %v1714_v38 }
 0x603   : > { %v1717_v37 = vmax.f32 %v1715_v39, 1e-09 }
 0x604   : > { %v1718_v40 = vmax.f32 %v1716_v36, 1e-09 }
 0x605   : > { %2183 = vlog2.f32 %v1717_v37 }
 0x606   : > { %2185 = vlog2.f32 %v1718_v40 }
 0x60f   : > { %v2184_v41 = vpop.eup %2183 }
 0x610   : > { %v2186_v44 = vpop.eup %2185  ;;  %v1720_v45 = vmul.f32 0.6931472, %v2184_v41 }
 0x611   : > { %v1722_v43 = vmul.f32 0.6931472, %v2186_v44 }
 0x612   : > { %v1723_v46 = vsub.f32 0.0, %v1720_v45 }
 0x613   : > { %v1724_v47 = vsub.f32 0.0, %v1722_v43 }
 0x614   : > { %v1725_v42 = vsel %vm687_vm0, %v1723_v46, 0.0 }
 0x615   : > { %v1726_v48 = vsel %vm687_vm0, %v1724_v47, 0.0 }
 0x616   : > { %v1727_v0 = vadd.f32 %v1726_v48, %v1725_v42 }
 0x618   : > { %1728 = vadd.xlane.f32.xlu0 %v1727_v0 }
 0x619   : > { %2200 = shalt.err (!%p2197_p5)
}
 0x61a   : > { %s2201_s21 = scalar_lea.hbm %s2688_s0, 128  ;;  %s2205_s23 = scalar_lea.hbm %s2815_s15, 256 }
 0x61b   : > { %p2202_p6 = scmp.ne.s32.totalorder %s2688_s0, %s2201_s21  ;;  %p2206_p10 = scmp.lt.u32.totalorder %s2688_s0, %s2815_s15 }
 0x61c   : > { %p2207_p11 = scmp.lt.u32.totalorder %s2205_s23, %s2201_s21  ;;  %p2209_p13 = scmp.lt.u32.totalorder %s2201_s21, %s2688_s0 }
 0x61d   : > { %p2203_p7 = pnand %p2202_p6, %p2466_p4 }
 0x61e   : > { %p2208_p12 = por %p2207_p11, %p2206_p10 }
 0x61f   : > { %p2204_p9 = pneg %p2203_p7 }
 0x620   : > { %p2210_p0 = por %p2209_p13, %p2208_p12 }
 0x622   : > { %p2211_p1 = pnand %p2210_p0, %p2204_p9 }
 0x624   : > { %2214 = shalt.err (!%p2211_p1)
}
 0x625   : > { %2043 = dma.vmem_to_hbm [thread:$0]  (%p2466_p4), %s1767_s18, 128, %s2688_s0, %s1742_s4  }
 0x626   : > { %s638_s18 = scalar_lea.vmem [#allocation6], %s2680_s28  ;;  %s2845_s4 = sadd.s32 4294967295, %s2325_s29  }
 0x627   : > { %s2711_s19 = sand.u32 1, %s2845_s4   ;;  %s632_s26 = scalar_lea.vmem [#allocation4], %s2680_s28 }
 0x628   : > { %s1780_s21 = sshll.u32 %s632_s26, 4  ;;  %s2015_s22 = sshll.u32 %s2317_s27, 4  ;;  %s2720_s21 = int_to_ptr.vmem [resolvable:$true] %s1780_s21 }
 0x629   : > { %s1794_s30 = sshll.u32 %s638_s18, 4  ;;  %s2846_s4 = sld [smem:[#allocation20_spill]]  ;;  %s2722_s30 = int_to_ptr.vmem [resolvable:$true] %s1794_s30 }
 0x62a   : > { %s2332_s2 = smov [#allocation4]  }
 0x62b   : > { %s2219_s17 = sshll.u32 %s2332_s2, 4  ;;  %s2220_s17 = int_to_ptr.vmem [resolvable:$false] %s2219_s17 }
 0x62c   : > { %s2221_s3 = scalar_lea.vmem %s2220_s17, 32  ;;  %p2222_p6 = scmp.lt.s32.totalorder %s2720_s21, %s2220_s17 }
 0x62f   : > { %s2727_s27 = scalar_lea.hbm %s2846_s4, %s2015_s22 }
 0x671   : > { %v1524_v9 = vpop.xlane.xlu1 %1523 }
 0x672   : > { %v1525_v49 = vrot.slane %v1524_v9, 4 }
 0x674   : > { %v1526_v50 = vadd.f32 %v1525_v49, %v1524_v9 }
 0x676   : > { %v1527_v51 = vrot.slane %v1526_v50, 2 }
 0x678   : > { %v1528_v52 = vadd.f32 %v1527_v51, %v1526_v50 }
 0x67a   : > { %v1529_v53 = vrot.slane %v1528_v52, 1 }
 0x67c   : > { %v1530_v54 = vadd.f32 %v1529_v53, %v1528_v52 }
 0x67e   : > { %2039 = vpush %v1530_v54 }
 0x6a5   : > { %v1729_v55 = vpop.xlane.xlu0 %1728 }
 0x6a6   : > { %v1730_v56 = vrot.slane %v1729_v55, 4 }
 0x6a8   : > { %v1731_v57 = vadd.f32 %v1730_v56, %v1729_v55 }
 0x6aa   : > { %v1732_v58 = vrot.slane %v1731_v57, 2 }
 0x6ac   : > { %v1733_v59 = vadd.f32 %v1732_v58, %v1731_v57 }
 0x6ae   : > { %v1734_v60 = vrot.slane %v1733_v59, 1 }
 0x6af   : > { %s2040_s24 = spop %2039 }
 0x6b0   : > { %s1532_s0 = smul.f32 1.442695, %s2040_s24  ;;  %v1735_v61 = vadd.f32 %v1734_v60, %v1733_v59  ;;  %s2718_s24 = scalar_lea.hbm %s2816_s16, %s2015_s22 }
 0x6b2   : > { %v1533_v62 = vstv %s1532_s0  ;;  %2041 = vpush %v1735_v61 }
 0x6b3   : > { %1534 = vst [vmem:[%s638_s18] sm:$0x1] %v1533_v62  ;;  %s1747_s18 = scalar_lea.sflag [#allocation5], %s2711_s19 }
 0x6e3   : > { %s2042_s23 = spop %2041 }
 0x6e4   : > { %s1737_s20 = smul.f32 1.442695, %s2042_s23  ;;  %s2215_s23 = scalar_lea.vmem %s2720_s21, 16 }
 0x6e5   : > { %p2216_p2 = scmp.ne.s32.totalorder %s2720_s21, %s2215_s23  ;;  %p2223_p7 = scmp.lt.s32.totalorder %s2221_s3, %s2215_s23 }
 0x6e6   : > { %v1738_v63 = vstv %s1737_s20 }
 0x6e7   : > { %1739 = vst [vmem:[%s632_s26] sm:$0x1] %v1738_v63  ;;  %p2217_p3 = pnand %p2216_p2, %p2466_p4  ;;  %p2224_p9 = por %p2223_p7, %p2222_p6 }
 0x6e9   : > { %p2218_p5 = pneg %p2217_p3 }
 0x6eb   : > { %p2225_p10 = pnand %p2224_p9, %p2218_p5 }
 0x6ed   : > { %2228 = shalt.err (!%p2225_p10)
}
 0x6ee   : > { %s2229_s26 = scalar_lea.hbm %s2718_s24, 16  ;;  %s2233_s0 = scalar_lea.hbm %s2816_s16, 32 }
 0x6ef   : > { %p2230_p11 = scmp.ne.s32.totalorder %s2718_s24, %s2229_s26  ;;  %p2234_p0 = scmp.lt.u32.totalorder %s2718_s24, %s2816_s16 }
 0x6f0   : > { %p2235_p1 = scmp.lt.u32.totalorder %s2233_s0, %s2229_s26  ;;  %p2237_p3 = scmp.lt.u32.totalorder %s2229_s26, %s2718_s24 }
 0x6f1   : > { %p2231_p12 = pnand %p2230_p11, %p2466_p4 }
 0x6f2   : > { %p2236_p2 = por %p2235_p1, %p2234_p0 }
 0x6f3   : > { %p2232_p13 = pneg %p2231_p12 }
 0x6f4   : > { %p2238_p5 = por %p2237_p3, %p2236_p2 }
 0x6f6   : > { %p2239_p6 = pnand %p2238_p5, %p2232_p13 }
 0x6f8   : > { %2242 = shalt.err (!%p2239_p6)
}
 0x6f9   : > { %2044 = dma.vmem_to_hbm [thread:$0]  (%p2466_p4), %s2720_s21, 16, %s2718_s24, %s1747_s18  }
 0x6fa   : > { %s2243_s3 = scalar_lea.vmem %s2722_s30, 16  ;;  %s2333_s23 = smov [#allocation6]  }
 0x6fb   : > { %p2244_p7 = scmp.ne.s32.totalorder %s2722_s30, %s2243_s3  ;;  %s2247_s17 = sshll.u32 %s2333_s23, 4  ;;  %s2248_s17 = int_to_ptr.vmem [resolvable:$false] %s2247_s17 }
 0x6fc   : > { %s2249_s26 = scalar_lea.vmem %s2248_s17, 32  ;;  %p2250_p11 = scmp.lt.s32.totalorder %s2722_s30, %s2248_s17 }
 0x6fd   : > { %p2245_p9 = pnand %p2244_p7, %p2466_p4  ;;  %p2251_p12 = scmp.lt.s32.totalorder %s2249_s26, %s2243_s3 }
 0x6ff   : > { %p2246_p10 = pneg %p2245_p9  ;;  %p2252_p13 = por %p2251_p12, %p2250_p11 }
 0x701   : > { %p2253_p0 = pnand %p2252_p13, %p2246_p10 }
 0x703   : > { %2256 = shalt.err (!%p2253_p0)
}
 0x704   : > { %s2257_s21 = scalar_lea.hbm %s2727_s27, 16  ;;  %s2261_s20 = scalar_lea.hbm %s2846_s4, 32 }
 0x705   : > { %p2258_p1 = scmp.ne.s32.totalorder %s2727_s27, %s2257_s21  ;;  %p2262_p5 = scmp.lt.u32.totalorder %s2727_s27, %s2846_s4 }
 0x706   : > { %p2263_p6 = scmp.lt.u32.totalorder %s2261_s20, %s2257_s21  ;;  %p2265_p9 = scmp.lt.u32.totalorder %s2257_s21, %s2727_s27 }
 0x707   : > { %p2259_p2 = pnand %p2258_p1, %p2466_p4 }
 0x708   : > { %p2264_p7 = por %p2263_p6, %p2262_p5 }
 0x709   : > { %p2260_p3 = pneg %p2259_p2 }
 0x70a   : > { %p2266_p10 = por %p2265_p9, %p2264_p7 }
 0x70c   : > { %p2267_p11 = pnand %p2266_p10, %p2260_p3 }
 0x70e   : > { %2270 = shalt.err (!%p2267_p11)
}
 0x70f   : > { %2045 = dma.vmem_to_hbm [thread:$0]  (%p2466_p4), %s2722_s30, 16, %s2727_s27, %s1747_s18  }
 0x710 PF: > { %s2847_s2 = sld [smem:[#allocation9_spill]]  ;;  %p2059_p12 = scmp.ge.s32.totalorder %s2325_s29, 2 }
 0x712   : > { %p2050_p13 = pnand %p2059_p12, %p2475_p8 }
 0x716   : > { %s1806_s23 = sand.u32 1, %s2847_s2  }
 0x717   : > { %s1807_s17 = scalar_lea.sflag [#allocation3], %s1806_s23 }
 0x718   : > { %2296 = dma.done.wait (!%p2050_p13), %s1807_s17, 128  }
 0x719   : > { %2298 = vsyncadd (!%p2050_p13), %s1807_s17, 4294967168  ;;  %s2849_s26 = sadd.s32 4294967294, %s2325_s29  }
 0x71a   : > { %s1815_s21 = sand.u32 1, %s2849_s26  }
 0x71b   : > { %s1816_s1 = scalar_lea.sflag [#allocation5], %s1815_s21 }
 0x71c   : > { %2300 = dma.done.wait (!%p2050_p13), %s1816_s1, 32  }
 0x71d   : > { %2302 = vsyncadd (!%p2050_p13), %s1816_s1, 4294967264  ;;  %s34_s29 = sadd.s32 1, %s2325_s29   ;;  %s2850_s19 = sld [smem:[#allocation10_spill]] }
 0x71e   : > { %p31_p4 = scmp.ge.s32.totalorder %s34_s29, 4   ;;  %s2851_s26 = sld [smem:[#allocation14_spill]] }
 0x71f   : > { %s2852_s27 = sld [smem:[#allocation11_spill]]  ;;  %s2853_s28 = sld [smem:[#allocation12_spill]] }
 0x720   : > { %s2854_s24 = smov %s2309_s25  ;;  %33 = sbr.rel (!%p31_p4) target bundleno = 13 (0xd), region = 159 }
 0x723   : > { %s2855_s25 = smov %s2850_s19 }
 0x727   :  { %1828 = vsyncpa [#allocation3], 1 }
 0x728   :  { %1830 = vsyncpa [#allocation3 + $0x1], 1 }
 0x729   :  { %1831 = vsyncpa [#allocation5], 1 }
 0x72a   :  { %1833 = vsyncpa [#allocation5 + $0x1], 1 }

</bundles_post_ra>
